<compile_context>
chip_gen: v7x
topology: tpu7x:2x2x1
jax: 0.10.0
libtpu: 0.0.40
codegen_flags: <defaults>
</compile_context>

<pallas_src>
import jax
import jax.numpy as jnp
from jax.experimental import pallas as pl
from jax.experimental.pallas import tpu as pltpu

# ---------------- model hyper-parameters (small, consistent with the module) ----
VOCAB       = 64      # len(word_dict)
NEMBED_WORD = 32      # args.nembed_word
NEMBED_CTX  = 32      # args.nembed_ctx
NHID_LANG   = 32      # args.nhid_lang
NHID_ATTN   = 32      # args.nhid_attn
NUM_ENT     = 7       # onecommon domain: 7 entities
DIM_ENT     = 4       # (x, y, size, color) per entity
INIT_RANGE  = 0.1     # args.init_range


# ---------------- packed-weight slab layout (static, module level) --------------

def _pack(specs):
    off, r = {}, 0
    for name, rows in specs:
        r = -(-r // 8) * 8          # align each segment to 8 sublanes
        off[name] = r
        r += rows
    return off, -(-r // 8) * 8


GRU_COLS = 3 * NHID_LANG
GRU_OFF, GRU_ROWS = _pack([
    ("wih", NEMBED_WORD), ("whh", NHID_LANG), ("bih", 1), ("bhh", 1),
])

MISC_COLS = 32
MISC_OFF, MISC_ROWS = _pack([
    ("word_embed", VOCAB),
    ("ctx_w", DIM_ENT), ("ctx_b", 1),
    ("attn_w1h", NHID_LANG), ("attn_w1c", NEMBED_CTX), ("attn_b1", 1),
    ("attn_w2", NHID_ATTN), ("attn_b2", 1), ("attn_w3", 1), ("attn_b3", 1),
    ("hid2out_wh", NHID_LANG), ("hid2out_wc", NEMBED_CTX), ("hid2out_b", 1),
    ("numref_w1", NHID_LANG), ("numref_b1", 1),
    ("numref_w2", NHID_LANG), ("numref_b2", 1),
])


# ================================ fused kernel ==================================

def _make_fused_kernel(S, B, M):
    H, E, C, A = NHID_LANG, NEMBED_WORD, NEMBED_CTX, NHID_ATTN
    NE, V = NUM_ENT, VOCAB
    SB = S * B
    Gb = S + M + 1               # query rows per batch: lang | markables | sel
    NSEL = B * (M + 1)           # one-hot gather rows: markable means + sel

    def kernel(tok_ref, tgt_ref, ctx_ref, gru_ref, w_ref, out_ref):
        f32 = jnp.float32

        def wslice(name, rows):
            o = MISC_OFF[name]
            return w_ref[o:o + rows, :]

        # ---- weights (static slices out of the two packed slabs) ----
        wih = gru_ref[GRU_OFF["wih"]:GRU_OFF["wih"] + E, :]       # (E, 3H)
        whh = gru_ref[GRU_OFF["whh"]:GRU_OFF["whh"] + H, :]       # (H, 3H)
        bih = gru_ref[GRU_OFF["bih"]:GRU_OFF["bih"] + 1, :]       # (1, 3H)
        bhh = gru_ref[GRU_OFF["bhh"]:GRU_OFF["bhh"] + 1, :]       # (1, 3H)

        w_emb  = wslice("word_embed", V)                          # (V, E)
        ctx_w  = wslice("ctx_w", DIM_ENT)                         # (DIM_ENT, C)
        ctx_bb = wslice("ctx_b", 1)                               # (1, C)
        a_w1h  = wslice("attn_w1h", H)                            # (H, A)
        a_w1c  = wslice("attn_w1c", C)                            # (C, A)
        a_b1   = wslice("attn_b1", 1)                             # (1, A)
        a_w2   = wslice("attn_w2", A)                             # (A, A)
        a_b2   = wslice("attn_b2", 1)                             # (1, A)
        a_w3   = wslice("attn_w3", 1)                             # (1, A)
        a_b3   = w_ref[MISC_OFF["attn_b3"]:MISC_OFF["attn_b3"] + 1, 0:1]   # (1, 1)
        h2o_wh = wslice("hid2out_wh", H)                          # (H, E)
        h2o_wc = wslice("hid2out_wc", C)                          # (C, E)
        h2o_b  = wslice("hid2out_b", 1)                           # (1, E)
        nr_w1  = wslice("numref_w1", H)                           # (H, H)
        nr_b1  = wslice("numref_b1", 1)                           # (1, H)
        nr_w2  = wslice("numref_w2", H)                           # (H, 32); cols 8: are 0
        nr_b2  = wslice("numref_b2", 1)                           # (1, 32); cols 8: are 0

        # ---- word embedding via one-hot matmul (tokens in time-major order) ----
        tok = tok_ref[...]                                        # (SB, 1) int32
        v_iota = jax.lax.broadcasted_iota(jnp.int32, (SB, V), 1)
        onehot = (v_iota == tok).astype(f32)                      # (SB, V)
        emb = jnp.dot(onehot, w_emb, preferred_element_type=f32)  # (SB, E)

        # ---- GRU reader: input gates hoisted into ONE matmul off the h-chain ----
        gi_all = jnp.dot(emb, wih, preferred_element_type=f32) + bih   # (SB, 3H)
        h = jnp.zeros((B, H), f32)
        hs = []
        for t in range(S):                                        # short, unrolled
            gi = gi_all[t * B:(t + 1) * B, :]
            gh = jnp.dot(h, whh, preferred_element_type=f32) + bhh
            rz = jax.nn.sigmoid(gi[:, :2 * H] + gh[:, :2 * H])    # fused r|z sigmoid
            r = rz[:, :H]
            z = rz[:, H:2 * H]
            n = jnp.tanh(gi[:, 2 * H:] + r * gh[:, 2 * H:])
            h = (1.0 - z) * n + z * h                             # PyTorch GRU update
            hs.append(h)

        # batch-major hidden stack: row b*S + t
        outs_bm = jnp.concatenate(
            [jnp.concatenate([hs[t][b:b + 1, :] for t in range(S)], axis=0)
             for b in range(B)], axis=0)                          # (B*S, H)

        # ---- markable means + selection states via one-hot selector matmul ----
        tgt = tgt_ref[...]                                        # (NSEL, 3) int32: b*S + t
        r_iota = jax.lax.broadcasted_iota(jnp.int32, (NSEL, SB), 1)
        sel_mat = ((r_iota == tgt[:, 0:1]).astype(f32)
                   + (r_iota == tgt[:, 1:2]).astype(f32)
                   + (r_iota == tgt[:, 2:3]).astype(f32)) * (1.0 / 3.0)
        gathered = jnp.dot(sel_mat, outs_bm, preferred_element_type=f32)   # (NSEL, H)

        # ---- ctx encoder: per-entity Linear + ReLU ----
        # TODO(synk): pluggable args.ctx_encoder_type realized as one per-entity MLP.
        ctx_h = jnp.maximum(
            jnp.dot(ctx_ref[...], ctx_w, preferred_element_type=f32) + ctx_bb,
            0.0)                                                  # (B*NE, C)

        # ---- batch-major query blocks: [lang (S) | markable means (M) | sel (1)] ----
        q_blocks = []
        for b in range(B):
            q_blocks.append(outs_bm[b * S:(b + 1) * S, :])
            q_blocks.append(gathered[b * (M + 1):(b + 1) * (M + 1), :])
        Q = jnp.concatenate(q_blocks, axis=0)                     # (B*Gb, H)

        # ---- shared attention MLP, stacked over (batch, entity): ONE W2 matmul ----
        q1 = jnp.dot(Q, a_w1h, preferred_element_type=f32)        # (B*Gb, A)
        c1 = jnp.dot(ctx_h, a_w1c, preferred_element_type=f32)    # (B*NE, A)
        blocks = []
        for b in range(B):
            qb = q1[b * Gb:(b + 1) * Gb, :]
            for e in range(NE):
                blocks.append(qb + c1[b * NE + e:b * NE + e + 1, :])
        h1 = jnp.tanh(jnp.concatenate(blocks, axis=0) + a_b1)     # (B*NE*Gb, A)
        h2 = jnp.tanh(jnp.dot(h1, a_w2, preferred_element_type=f32) + a_b2)
        col = jnp.sum(h2 * a_w3, axis=-1, keepdims=True) + a_b3   # (B*NE*Gb, 1)

        # ---- per-batch: score assembly (entities on lanes), softmax, ctx mix ----
        ref_list, sel_list, ctxlang_list = [], [], []
        for b in range(B):
            sc = jnp.concatenate(
                [col[(b * NE + e) * Gb:(b * NE + e + 1) * Gb, :] for e in range(NE)],
                axis=1)                                           # (Gb, NE)
            lang_sc = sc[0:S, :]
            ref_list.append(sc[S:S + M, :])                       # (M, NE)
            sel_list.append(sc[S + M:S + M + 1, :])               # (1, NE)
            mx = jnp.max(lang_sc, axis=-1, keepdims=True)
            p = jnp.exp(lang_sc - mx)
            p = p / jnp.sum(p, axis=-1, keepdims=True)            # softmax over entities
            ctx_bh = ctx_h[b * NE:(b + 1) * NE, :]                # (NE, C)
            ctxlang_list.append(jnp.dot(p, ctx_bh, preferred_element_type=f32))  # (S, C)

        ctx_h_lang = jnp.concatenate(ctxlang_list, axis=0)        # (B*S, C)

        # ---- hid2output (split concat weights) + tied vocab projection ----
        pre = (jnp.dot(outs_bm, h2o_wh, preferred_element_type=f32)
               + jnp.dot(ctx_h_lang, h2o_wc, preferred_element_type=f32)
               + h2o_b)
        out_emb = jnp.tanh(pre)                                   # (B*S, E)
        outs_lm = jax.lax.dot_general(                            # out_emb @ word_embed^T
            out_emb, w_emb, (((1,), (1,)), ((), ())),
            preferred_element_type=f32)                           # (B*S, V)

        # ---- num_ref_predictor on the markable means ----
        means = jnp.concatenate(
            [gathered[b * (M + 1):b * (M + 1) + M, :] for b in range(B)], axis=0)  # (B*M, H)
        nr_h = jnp.tanh(jnp.dot(means, nr_w1, preferred_element_type=f32) + nr_b1)
        nr_out = jnp.dot(nr_h, nr_w2, preferred_element_type=f32) + nr_b2  # (B*M, 32); 0:8 valid

        # ---- pack everything into one output slab, single unmasked store ----
        ref_sc = jnp.concatenate(ref_list, axis=0)                # (B*M, NE)
        sel_sc = jnp.concatenate(sel_list, axis=0)                # (B, NE)
        rowB = jnp.concatenate(
            [ref_sc,
             jnp.zeros((B * M, 8 - NE), f32),
             nr_out,
             jnp.zeros((B * M, V - 8 - 32), f32)], axis=1)        # (B*M, V)
        rowC = jnp.concatenate(
            [sel_sc, jnp.zeros((B, V - NE), f32)], axis=1)        # (B, V)
        out_ref[...] = jnp.concatenate([outs_lm, rowB, rowC], axis=0)

    return kernel


def fused_forward(tok, tgt, ctx_flat, gru_slab, misc_slab, *, S, B, M):
    n_rows = B * S + B * M + B
    return pl.pallas_call(
        _make_fused_kernel(S, B, M),
        out_shape=jax.ShapeDtypeStruct((n_rows, VOCAB), jnp.float32),
    )(tok, tgt, ctx_flat, gru_slab, misc_slab)


# ================================ model glue ====================================

@jax.jit
def forward(params, ctx, inpt, ref_inpt, sel_idx):
    """ctx: (NUM_ENT*DIM_ENT, B) f32, inpt: (S, B) i32,
       ref_inpt: (B, M, 3) i32, sel_idx: (B,) i32"""
    B = ctx.shape[1]
    S = inpt.shape[0]
    M = ref_inpt.shape[1]

    # ---- tiny input prep (fused by XLA): tokens, gather targets, ctx features ----
    tok = inpt.astype(jnp.int32).reshape(S * B, 1)                 # time-major tokens
    boff = jnp.arange(B, dtype=jnp.int32) * S
    ref_tgt = ref_inpt.astype(jnp.int32) + boff[:, None, None]     # (B, M, 3): b*S + t
    sel_tgt = jnp.broadcast_to(
        (sel_idx.astype(jnp.int32) + boff)[:, None, None], (B, 1, 3))
    tgt = jnp.concatenate([ref_tgt, sel_tgt], axis=1).reshape(B * (M + 1), 3)
    ctx_flat = ctx.T.reshape(B * NUM_ENT, DIM_ENT)                 # (B*NUM_ENT, DIM_ENT)

    # ---- single fused Pallas kernel ----
    slab = fused_forward(tok, tgt, ctx_flat,
                         params["gru_slab"], params["misc_slab"], S=S, B=B, M=M)

    # ---- unpack output slab (tiny slices / transposes) ----
    outs = jnp.transpose(
        slab[0:B * S, :].reshape(B, S, VOCAB), (1, 0, 2)).reshape(S * B, VOCAB)
    r0 = B * S
    ref_out = jnp.transpose(
        slab[r0:r0 + B * M, 0:NUM_ENT].reshape(B, M, NUM_ENT), (1, 0, 2))
    num_ref_out = jnp.transpose(
        slab[r0:r0 + B * M, 8:16].reshape(B, M, 8), (1, 0, 2))
    sel_out = slab[r0 + B * M:r0 + B * M + B, 0:NUM_ENT]
    return outs, ref_out, num_ref_out, sel_out


# ================================ params ========================================

def init_params(key):
    ks = jax.random.split(key, 24)
    u = lambda k, shape: jax.random.uniform(k, shape, jnp.float32,
                                            -INIT_RANGE, INIT_RANGE)
    H, C, A, E = NHID_LANG, NEMBED_CTX, NHID_ATTN, NEMBED_WORD

    # GRU slab: [wih_t | whh_t | bih | bhh], column order of gates = [r|z|n]
    gru = jnp.zeros((GRU_ROWS, GRU_COLS), jnp.float32)
    gru = gru.at[GRU_OFF["wih"]:GRU_OFF["wih"] + E, :].set(u(ks[0], (E, 3 * H)))
    gru = gru.at[GRU_OFF["whh"]:GRU_OFF["whh"] + H, :].set(u(ks[1], (H, 3 * H)))
    gru = gru.at[GRU_OFF["bih"]:GRU_OFF["bih"] + 1, :].set(u(ks[2], (1, 3 * H)))
    gru = gru.at[GRU_OFF["bhh"]:GRU_OFF["bhh"] + 1, :].set(u(ks[3], (1, 3 * H)))

    # misc slab: word_embed (stored once -> tied vocab projection stays tied),
    # ctx encoder, shared attention (first Linear split into H / C halves),
    # hid2output (split), num_ref_predictor (last Linear zero-padded 8 -> 32).
    misc = jnp.zeros((MISC_ROWS, MISC_COLS), jnp.float32)

    def put(m, name, k, shape):
        o = MISC_OFF[name]
        return m.at[o:o + shape[0], 0:shape[1]].set(u(k, shape))

    misc = put(misc, "word_embed", ks[4], (VOCAB, E))
    misc = put(misc, "ctx_w",      ks[5], (DIM_ENT, C))
    misc = put(misc, "ctx_b",      ks[6], (1, C))
    misc = put(misc, "attn_w1h",   ks[7], (H, A))
    misc = put(misc, "attn_w1c",   ks[8], (C, A))
    misc = put(misc, "attn_b1",    ks[9], (1, A))
    misc = put(misc, "attn_w2",    ks[10], (A, A))
    misc = put(misc, "attn_b2",    ks[11], (1, A))
    misc = put(misc, "attn_w3",    ks[12], (1, A))
    misc = put(misc, "attn_b3",    ks[13], (1, 1))
    misc = put(misc, "hid2out_wh", ks[14], (H, E))
    misc = put(misc, "hid2out_wc", ks[15], (C, E))
    misc = put(misc, "hid2out_b",  ks[16], (1, E))
    misc = put(misc, "numref_w1",  ks[17], (H, H))
    misc = put(misc, "numref_b1",  ks[18], (1, H))
    misc = put(misc, "numref_w2",  ks[19], (H, 8))
    misc = put(misc, "numref_b2",  ks[20], (1, 8))
    return {"gru_slab": gru, "misc_slab": misc}


# ================================ main ==========================================

if __name__ == "__main__":
    key = jax.random.PRNGKey(0)
    pkey, k1, k2, k3, k4 = jax.random.split(key, 5)
    params = init_params(pkey)

    B, S, M = 2, 8, 3   # batch, sequence length, number of markables
    ctx = jax.random.uniform(k1, (NUM_ENT * DIM_ENT, B), jnp.float32, -1.0, 1.0)
    inpt = jax.random.randint(k2, (S, B), 0, VOCAB, dtype=jnp.int32)
    ref_inpt = jax.random.randint(k3, (B, M, 3), 0, S, dtype=jnp.int32)
    sel_idx = jax.random.randint(k4, (B,), 0, S, dtype=jnp.int32)

    outs, ref_out, num_ref_out, sel_out = jax.block_until_ready(
        forward(params, ctx, inpt, ref_inpt, sel_idx))

    assert outs.shape == (S * B, VOCAB)
    assert ref_out.shape == (M, B, NUM_ENT)
    assert num_ref_out.shape == (M, B, 8)
    assert sel_out.shape == (B, NUM_ENT)
    assert all(bool(jnp.all(jnp.isfinite(t)))
               for t in (outs, ref_out, num_ref_out, sel_out))
    print("KERNEL_OK")
</pallas_src>

<mosaic_0001>
module attributes {stable_mosaic.version = 11 : i64} {
  func.func @kernel(%arg0: memref<16x1xi32, #tpu.memory_space<vmem>>, %arg1: memref<8x3xi32, #tpu.memory_space<vmem>>, %arg2: memref<14x4xf32, #tpu.memory_space<vmem>>, %arg3: memref<80x96xf32, #tpu.memory_space<vmem>>, %arg4: memref<360x32xf32, #tpu.memory_space<vmem>>, %arg5: memref<24x64xf32, #tpu.memory_space<vmem>>) attributes {dimension_semantics = [], scalar_prefetch = 0 : i64, scratch_operands = 0 : i64, tpu.core_type = #tpu.core_type<tc>} {
    %c0 = arith.constant 0 : index
    %c0_0 = arith.constant 0 : index
    %0 = vector.load %arg3[%c0, %c0_0] : memref<80x96xf32, #tpu.memory_space<vmem>>, vector<32x96xf32>
    %c32 = arith.constant 32 : index
    %c0_1 = arith.constant 0 : index
    %1 = vector.load %arg3[%c32, %c0_1] : memref<80x96xf32, #tpu.memory_space<vmem>>, vector<32x96xf32>
    %c64 = arith.constant 64 : index
    %c0_2 = arith.constant 0 : index
    %2 = vector.load %arg3[%c64, %c0_2] : memref<80x96xf32, #tpu.memory_space<vmem>>, vector<1x96xf32>
    %c72 = arith.constant 72 : index
    %c0_3 = arith.constant 0 : index
    %3 = vector.load %arg3[%c72, %c0_3] : memref<80x96xf32, #tpu.memory_space<vmem>>, vector<1x96xf32>
    %c0_4 = arith.constant 0 : index
    %c0_5 = arith.constant 0 : index
    %4 = vector.load %arg4[%c0_4, %c0_5] : memref<360x32xf32, #tpu.memory_space<vmem>>, vector<64x32xf32>
    %c64_6 = arith.constant 64 : index
    %c0_7 = arith.constant 0 : index
    %5 = vector.load %arg4[%c64_6, %c0_7] : memref<360x32xf32, #tpu.memory_space<vmem>>, vector<4x32xf32>
    %c72_8 = arith.constant 72 : index
    %c0_9 = arith.constant 0 : index
    %6 = vector.load %arg4[%c72_8, %c0_9] : memref<360x32xf32, #tpu.memory_space<vmem>>, vector<1x32xf32>
    %c80 = arith.constant 80 : index
    %c0_10 = arith.constant 0 : index
    %7 = vector.load %arg4[%c80, %c0_10] : memref<360x32xf32, #tpu.memory_space<vmem>>, vector<32x32xf32>
    %c112 = arith.constant 112 : index
    %c0_11 = arith.constant 0 : index
    %8 = vector.load %arg4[%c112, %c0_11] : memref<360x32xf32, #tpu.memory_space<vmem>>, vector<32x32xf32>
    %c144 = arith.constant 144 : index
    %c0_12 = arith.constant 0 : index
    %9 = vector.load %arg4[%c144, %c0_12] : memref<360x32xf32, #tpu.memory_space<vmem>>, vector<1x32xf32>
    %c152 = arith.constant 152 : index
    %c0_13 = arith.constant 0 : index
    %10 = vector.load %arg4[%c152, %c0_13] : memref<360x32xf32, #tpu.memory_space<vmem>>, vector<32x32xf32>
    %c184 = arith.constant 184 : index
    %c0_14 = arith.constant 0 : index
    %11 = vector.load %arg4[%c184, %c0_14] : memref<360x32xf32, #tpu.memory_space<vmem>>, vector<1x32xf32>
    %c192 = arith.constant 192 : index
    %c0_15 = arith.constant 0 : index
    %12 = vector.load %arg4[%c192, %c0_15] : memref<360x32xf32, #tpu.memory_space<vmem>>, vector<1x32xf32>
    %c200 = arith.constant 200 : index
    %c0_16 = arith.constant 0 : index
    %13 = vector.load %arg4[%c200, %c0_16] : memref<360x32xf32, #tpu.memory_space<vmem>>, vector<1x1xf32>
    %c208 = arith.constant 208 : index
    %c0_17 = arith.constant 0 : index
    %14 = vector.load %arg4[%c208, %c0_17] : memref<360x32xf32, #tpu.memory_space<vmem>>, vector<32x32xf32>
    %c240 = arith.constant 240 : index
    %c0_18 = arith.constant 0 : index
    %15 = vector.load %arg4[%c240, %c0_18] : memref<360x32xf32, #tpu.memory_space<vmem>>, vector<32x32xf32>
    %c272 = arith.constant 272 : index
    %c0_19 = arith.constant 0 : index
    %16 = vector.load %arg4[%c272, %c0_19] : memref<360x32xf32, #tpu.memory_space<vmem>>, vector<1x32xf32>
    %c280 = arith.constant 280 : index
    %c0_20 = arith.constant 0 : index
    %17 = vector.load %arg4[%c280, %c0_20] : memref<360x32xf32, #tpu.memory_space<vmem>>, vector<32x32xf32>
    %c312 = arith.constant 312 : index
    %c0_21 = arith.constant 0 : index
    %18 = vector.load %arg4[%c312, %c0_21] : memref<360x32xf32, #tpu.memory_space<vmem>>, vector<1x32xf32>
    %c320 = arith.constant 320 : index
    %c0_22 = arith.constant 0 : index
    %19 = vector.load %arg4[%c320, %c0_22] : memref<360x32xf32, #tpu.memory_space<vmem>>, vector<32x32xf32>
    %c352 = arith.constant 352 : index
    %c0_23 = arith.constant 0 : index
    %20 = vector.load %arg4[%c352, %c0_23] : memref<360x32xf32, #tpu.memory_space<vmem>>, vector<1x32xf32>
    %c0_24 = arith.constant 0 : index
    %c0_25 = arith.constant 0 : index
    %21 = vector.load %arg0[%c0_24, %c0_25] : memref<16x1xi32, #tpu.memory_space<vmem>>, vector<16x1xi32>
    %22 = tpu.iota {dimensions = array<i32: 1>} : vector<16x64xi32>
    %23 = vector.broadcast %21 : vector<16x1xi32> to vector<16x64xi32>
    %24 = arith.cmpi eq, %22, %23 : vector<16x64xi32>
    %25 = arith.extui %24 : vector<16x64xi1> to vector<16x64xi32>
    %26 = arith.sitofp %25 : vector<16x64xi32> to vector<16x64xf32>
    %cst = arith.constant dense<0.000000e+00> : vector<16x32xf32>
    %27 = tpu.matmul %26, %4, %cst {dimension_numbers = #tpu.dot_dimension_numbers<[1], [0], [0], [1], [0, 0, 1, 1], [], []>} : vector<16x64xf32>, vector<64x32xf32>, vector<16x32xf32> -> vector<16x32xf32>
    %cst_26 = arith.constant dense<0.000000e+00> : vector<16x96xf32>
    %28 = tpu.matmul %27, %0, %cst_26 {dimension_numbers = #tpu.dot_dimension_numbers<[1], [0], [0], [1], [0, 0, 1, 1], [], []>} : vector<16x32xf32>, vector<32x96xf32>, vector<16x96xf32> -> vector<16x96xf32>
    %29 = vector.broadcast %2 : vector<1x96xf32> to vector<16x96xf32>
    %30 = arith.addf %28, %29 : vector<16x96xf32>
    %cst_27 = arith.constant 0.000000e+00 : f32
    %31 = vector.broadcast %cst_27 : f32 to vector<2x32xf32>
    %32 = vector.extract_strided_slice %30 {offsets = [0, 0], sizes = [2, 96], strides = [1, 1]} : vector<16x96xf32> to vector<2x96xf32>
    %cst_28 = arith.constant dense<0.000000e+00> : vector<2x96xf32>
    %33 = tpu.matmul %31, %1, %cst_28 {dimension_numbers = #tpu.dot_dimension_numbers<[1], [0], [0], [1], [0, 0, 1, 1], [], []>} : vector<2x32xf32>, vector<32x96xf32>, vector<2x96xf32> -> vector<2x96xf32>
    %34 = vector.broadcast %3 : vector<1x96xf32> to vector<2x96xf32>
    %35 = arith.addf %33, %34 : vector<2x96xf32>
    %36 = vector.extract_strided_slice %32 {offsets = [0, 0], sizes = [2, 64], strides = [1, 1]} : vector<2x96xf32> to vector<2x64xf32>
    %37 = vector.extract_strided_slice %35 {offsets = [0, 0], sizes = [2, 64], strides = [1, 1]} : vector<2x96xf32> to vector<2x64xf32>
    %38 = arith.addf %36, %37 : vector<2x64xf32>
    %39 = arith.negf %38 : vector<2x64xf32>
    %40 = math.exp %39 : vector<2x64xf32>
    %cst_29 = arith.constant 1.000000e+00 : f32
    %41 = vector.broadcast %cst_29 : f32 to vector<2x64xf32>
    %42 = arith.addf %41, %40 : vector<2x64xf32>
    %43 = arith.divf %41, %42 : vector<2x64xf32>
    %44 = vector.extract_strided_slice %43 {offsets = [0, 0], sizes = [2, 32], strides = [1, 1]} : vector<2x64xf32> to vector<2x32xf32>
    %45 = vector.extract_strided_slice %43 {offsets = [0, 32], sizes = [2, 32], strides = [1, 1]} : vector<2x64xf32> to vector<2x32xf32>
    %46 = vector.extract_strided_slice %32 {offsets = [0, 64], sizes = [2, 32], strides = [1, 1]} : vector<2x96xf32> to vector<2x32xf32>
    %47 = vector.extract_strided_slice %35 {offsets = [0, 64], sizes = [2, 32], strides = [1, 1]} : vector<2x96xf32> to vector<2x32xf32>
    %48 = arith.mulf %44, %47 : vector<2x32xf32>
    %49 = arith.addf %46, %48 : vector<2x32xf32>
    %50 = math.tanh %49 : vector<2x32xf32>
    %cst_30 = arith.constant 1.000000e+00 : f32
    %51 = vector.broadcast %cst_30 : f32 to vector<2x32xf32>
    %52 = arith.subf %51, %45 : vector<2x32xf32>
    %53 = arith.mulf %52, %50 : vector<2x32xf32>
    %54 = arith.mulf %45, %31 : vector<2x32xf32>
    %55 = arith.addf %53, %54 : vector<2x32xf32>
    %56 = vector.extract_strided_slice %30 {offsets = [2, 0], sizes = [2, 96], strides = [1, 1]} : vector<16x96xf32> to vector<2x96xf32>
    %cst_31 = arith.constant dense<0.000000e+00> : vector<2x96xf32>
    %57 = tpu.matmul %55, %1, %cst_31 {dimension_numbers = #tpu.dot_dimension_numbers<[1], [0], [0], [1], [0, 0, 1, 1], [], []>} : vector<2x32xf32>, vector<32x96xf32>, vector<2x96xf32> -> vector<2x96xf32>
    %58 = vector.broadcast %3 : vector<1x96xf32> to vector<2x96xf32>
    %59 = arith.addf %57, %58 : vector<2x96xf32>
    %60 = vector.extract_strided_slice %56 {offsets = [0, 0], sizes = [2, 64], strides = [1, 1]} : vector<2x96xf32> to vector<2x64xf32>
    %61 = vector.extract_strided_slice %59 {offsets = [0, 0], sizes = [2, 64], strides = [1, 1]} : vector<2x96xf32> to vector<2x64xf32>
    %62 = arith.addf %60, %61 : vector<2x64xf32>
    %63 = arith.negf %62 : vector<2x64xf32>
    %64 = math.exp %63 : vector<2x64xf32>
    %cst_32 = arith.constant 1.000000e+00 : f32
    %65 = vector.broadcast %cst_32 : f32 to vector<2x64xf32>
    %66 = arith.addf %65, %64 : vector<2x64xf32>
    %67 = arith.divf %65, %66 : vector<2x64xf32>
    %68 = vector.extract_strided_slice %67 {offsets = [0, 0], sizes = [2, 32], strides = [1, 1]} : vector<2x64xf32> to vector<2x32xf32>
    %69 = vector.extract_strided_slice %67 {offsets = [0, 32], sizes = [2, 32], strides = [1, 1]} : vector<2x64xf32> to vector<2x32xf32>
    %70 = vector.extract_strided_slice %56 {offsets = [0, 64], sizes = [2, 32], strides = [1, 1]} : vector<2x96xf32> to vector<2x32xf32>
    %71 = vector.extract_strided_slice %59 {offsets = [0, 64], sizes = [2, 32], strides = [1, 1]} : vector<2x96xf32> to vector<2x32xf32>
    %72 = arith.mulf %68, %71 : vector<2x32xf32>
    %73 = arith.addf %70, %72 : vector<2x32xf32>
    %74 = math.tanh %73 : vector<2x32xf32>
    %cst_33 = arith.constant 1.000000e+00 : f32
    %75 = vector.broadcast %cst_33 : f32 to vector<2x32xf32>
    %76 = arith.subf %75, %69 : vector<2x32xf32>
    %77 = arith.mulf %76, %74 : vector<2x32xf32>
    %78 = arith.mulf %69, %55 : vector<2x32xf32>
    %79 = arith.addf %77, %78 : vector<2x32xf32>
    %80 = vector.extract_strided_slice %30 {offsets = [4, 0], sizes = [2, 96], strides = [1, 1]} : vector<16x96xf32> to vector<2x96xf32>
    %cst_34 = arith.constant dense<0.000000e+00> : vector<2x96xf32>
    %81 = tpu.matmul %79, %1, %cst_34 {dimension_numbers = #tpu.dot_dimension_numbers<[1], [0], [0], [1], [0, 0, 1, 1], [], []>} : vector<2x32xf32>, vector<32x96xf32>, vector<2x96xf32> -> vector<2x96xf32>
    %82 = vector.broadcast %3 : vector<1x96xf32> to vector<2x96xf32>
    %83 = arith.addf %81, %82 : vector<2x96xf32>
    %84 = vector.extract_strided_slice %80 {offsets = [0, 0], sizes = [2, 64], strides = [1, 1]} : vector<2x96xf32> to vector<2x64xf32>
    %85 = vector.extract_strided_slice %83 {offsets = [0, 0], sizes = [2, 64], strides = [1, 1]} : vector<2x96xf32> to vector<2x64xf32>
    %86 = arith.addf %84, %85 : vector<2x64xf32>
    %87 = arith.negf %86 : vector<2x64xf32>
    %88 = math.exp %87 : vector<2x64xf32>
    %cst_35 = arith.constant 1.000000e+00 : f32
    %89 = vector.broadcast %cst_35 : f32 to vector<2x64xf32>
    %90 = arith.addf %89, %88 : vector<2x64xf32>
    %91 = arith.divf %89, %90 : vector<2x64xf32>
    %92 = vector.extract_strided_slice %91 {offsets = [0, 0], sizes = [2, 32], strides = [1, 1]} : vector<2x64xf32> to vector<2x32xf32>
    %93 = vector.extract_strided_slice %91 {offsets = [0, 32], sizes = [2, 32], strides = [1, 1]} : vector<2x64xf32> to vector<2x32xf32>
    %94 = vector.extract_strided_slice %80 {offsets = [0, 64], sizes = [2, 32], strides = [1, 1]} : vector<2x96xf32> to vector<2x32xf32>
    %95 = vector.extract_strided_slice %83 {offsets = [0, 64], sizes = [2, 32], strides = [1, 1]} : vector<2x96xf32> to vector<2x32xf32>
    %96 = arith.mulf %92, %95 : vector<2x32xf32>
    %97 = arith.addf %94, %96 : vector<2x32xf32>
    %98 = math.tanh %97 : vector<2x32xf32>
    %cst_36 = arith.constant 1.000000e+00 : f32
    %99 = vector.broadcast %cst_36 : f32 to vector<2x32xf32>
    %100 = arith.subf %99, %93 : vector<2x32xf32>
    %101 = arith.mulf %100, %98 : vector<2x32xf32>
    %102 = arith.mulf %93, %79 : vector<2x32xf32>
    %103 = arith.addf %101, %102 : vector<2x32xf32>
    %104 = vector.extract_strided_slice %30 {offsets = [6, 0], sizes = [2, 96], strides = [1, 1]} : vector<16x96xf32> to vector<2x96xf32>
    %cst_37 = arith.constant dense<0.000000e+00> : vector<2x96xf32>
    %105 = tpu.matmul %103, %1, %cst_37 {dimension_numbers = #tpu.dot_dimension_numbers<[1], [0], [0], [1], [0, 0, 1, 1], [], []>} : vector<2x32xf32>, vector<32x96xf32>, vector<2x96xf32> -> vector<2x96xf32>
    %106 = vector.broadcast %3 : vector<1x96xf32> to vector<2x96xf32>
    %107 = arith.addf %105, %106 : vector<2x96xf32>
    %108 = vector.extract_strided_slice %104 {offsets = [0, 0], sizes = [2, 64], strides = [1, 1]} : vector<2x96xf32> to vector<2x64xf32>
    %109 = vector.extract_strided_slice %107 {offsets = [0, 0], sizes = [2, 64], strides = [1, 1]} : vector<2x96xf32> to vector<2x64xf32>
    %110 = arith.addf %108, %109 : vector<2x64xf32>
    %111 = arith.negf %110 : vector<2x64xf32>
    %112 = math.exp %111 : vector<2x64xf32>
    %cst_38 = arith.constant 1.000000e+00 : f32
    %113 = vector.broadcast %cst_38 : f32 to vector<2x64xf32>
    %114 = arith.addf %113, %112 : vector<2x64xf32>
    %115 = arith.divf %113, %114 : vector<2x64xf32>
    %116 = vector.extract_strided_slice %115 {offsets = [0, 0], sizes = [2, 32], strides = [1, 1]} : vector<2x64xf32> to vector<2x32xf32>
    %117 = vector.extract_strided_slice %115 {offsets = [0, 32], sizes = [2, 32], strides = [1, 1]} : vector<2x64xf32> to vector<2x32xf32>
    %118 = vector.extract_strided_slice %104 {offsets = [0, 64], sizes = [2, 32], strides = [1, 1]} : vector<2x96xf32> to vector<2x32xf32>
    %119 = vector.extract_strided_slice %107 {offsets = [0, 64], sizes = [2, 32], strides = [1, 1]} : vector<2x96xf32> to vector<2x32xf32>
    %120 = arith.mulf %116, %119 : vector<2x32xf32>
    %121 = arith.addf %118, %120 : vector<2x32xf32>
    %122 = math.tanh %121 : vector<2x32xf32>
    %cst_39 = arith.constant 1.000000e+00 : f32
    %123 = vector.broadcast %cst_39 : f32 to vector<2x32xf32>
    %124 = arith.subf %123, %117 : vector<2x32xf32>
    %125 = arith.mulf %124, %122 : vector<2x32xf32>
    %126 = arith.mulf %117, %103 : vector<2x32xf32>
    %127 = arith.addf %125, %126 : vector<2x32xf32>
    %128 = vector.extract_strided_slice %30 {offsets = [8, 0], sizes = [2, 96], strides = [1, 1]} : vector<16x96xf32> to vector<2x96xf32>
    %cst_40 = arith.constant dense<0.000000e+00> : vector<2x96xf32>
    %129 = tpu.matmul %127, %1, %cst_40 {dimension_numbers = #tpu.dot_dimension_numbers<[1], [0], [0], [1], [0, 0, 1, 1], [], []>} : vector<2x32xf32>, vector<32x96xf32>, vector<2x96xf32> -> vector<2x96xf32>
    %130 = vector.broadcast %3 : vector<1x96xf32> to vector<2x96xf32>
    %131 = arith.addf %129, %130 : vector<2x96xf32>
    %132 = vector.extract_strided_slice %128 {offsets = [0, 0], sizes = [2, 64], strides = [1, 1]} : vector<2x96xf32> to vector<2x64xf32>
    %133 = vector.extract_strided_slice %131 {offsets = [0, 0], sizes = [2, 64], strides = [1, 1]} : vector<2x96xf32> to vector<2x64xf32>
    %134 = arith.addf %132, %133 : vector<2x64xf32>
    %135 = arith.negf %134 : vector<2x64xf32>
    %136 = math.exp %135 : vector<2x64xf32>
    %cst_41 = arith.constant 1.000000e+00 : f32
    %137 = vector.broadcast %cst_41 : f32 to vector<2x64xf32>
    %138 = arith.addf %137, %136 : vector<2x64xf32>
    %139 = arith.divf %137, %138 : vector<2x64xf32>
    %140 = vector.extract_strided_slice %139 {offsets = [0, 0], sizes = [2, 32], strides = [1, 1]} : vector<2x64xf32> to vector<2x32xf32>
    %141 = vector.extract_strided_slice %139 {offsets = [0, 32], sizes = [2, 32], strides = [1, 1]} : vector<2x64xf32> to vector<2x32xf32>
    %142 = vector.extract_strided_slice %128 {offsets = [0, 64], sizes = [2, 32], strides = [1, 1]} : vector<2x96xf32> to vector<2x32xf32>
    %143 = vector.extract_strided_slice %131 {offsets = [0, 64], sizes = [2, 32], strides = [1, 1]} : vector<2x96xf32> to vector<2x32xf32>
    %144 = arith.mulf %140, %143 : vector<2x32xf32>
    %145 = arith.addf %142, %144 : vector<2x32xf32>
    %146 = math.tanh %145 : vector<2x32xf32>
    %cst_42 = arith.constant 1.000000e+00 : f32
    %147 = vector.broadcast %cst_42 : f32 to vector<2x32xf32>
    %148 = arith.subf %147, %141 : vector<2x32xf32>
    %149 = arith.mulf %148, %146 : vector<2x32xf32>
    %150 = arith.mulf %141, %127 : vector<2x32xf32>
    %151 = arith.addf %149, %150 : vector<2x32xf32>
    %152 = vector.extract_strided_slice %30 {offsets = [10, 0], sizes = [2, 96], strides = [1, 1]} : vector<16x96xf32> to vector<2x96xf32>
    %cst_43 = arith.constant dense<0.000000e+00> : vector<2x96xf32>
    %153 = tpu.matmul %151, %1, %cst_43 {dimension_numbers = #tpu.dot_dimension_numbers<[1], [0], [0], [1], [0, 0, 1, 1], [], []>} : vector<2x32xf32>, vector<32x96xf32>, vector<2x96xf32> -> vector<2x96xf32>
    %154 = vector.broadcast %3 : vector<1x96xf32> to vector<2x96xf32>
    %155 = arith.addf %153, %154 : vector<2x96xf32>
    %156 = vector.extract_strided_slice %152 {offsets = [0, 0], sizes = [2, 64], strides = [1, 1]} : vector<2x96xf32> to vector<2x64xf32>
    %157 = vector.extract_strided_slice %155 {offsets = [0, 0], sizes = [2, 64], strides = [1, 1]} : vector<2x96xf32> to vector<2x64xf32>
    %158 = arith.addf %156, %157 : vector<2x64xf32>
    %159 = arith.negf %158 : vector<2x64xf32>
    %160 = math.exp %159 : vector<2x64xf32>
    %cst_44 = arith.constant 1.000000e+00 : f32
    %161 = vector.broadcast %cst_44 : f32 to vector<2x64xf32>
    %162 = arith.addf %161, %160 : vector<2x64xf32>
    %163 = arith.divf %161, %162 : vector<2x64xf32>
    %164 = vector.extract_strided_slice %163 {offsets = [0, 0], sizes = [2, 32], strides = [1, 1]} : vector<2x64xf32> to vector<2x32xf32>
    %165 = vector.extract_strided_slice %163 {offsets = [0, 32], sizes = [2, 32], strides = [1, 1]} : vector<2x64xf32> to vector<2x32xf32>
    %166 = vector.extract_strided_slice %152 {offsets = [0, 64], sizes = [2, 32], strides = [1, 1]} : vector<2x96xf32> to vector<2x32xf32>
    %167 = vector.extract_strided_slice %155 {offsets = [0, 64], sizes = [2, 32], strides = [1, 1]} : vector<2x96xf32> to vector<2x32xf32>
    %168 = arith.mulf %164, %167 : vector<2x32xf32>
    %169 = arith.addf %166, %168 : vector<2x32xf32>
    %170 = math.tanh %169 : vector<2x32xf32>
    %cst_45 = arith.constant 1.000000e+00 : f32
    %171 = vector.broadcast %cst_45 : f32 to vector<2x32xf32>
    %172 = arith.subf %171, %165 : vector<2x32xf32>
    %173 = arith.mulf %172, %170 : vector<2x32xf32>
    %174 = arith.mulf %165, %151 : vector<2x32xf32>
    %175 = arith.addf %173, %174 : vector<2x32xf32>
    %176 = vector.extract_strided_slice %30 {offsets = [12, 0], sizes = [2, 96], strides = [1, 1]} : vector<16x96xf32> to vector<2x96xf32>
    %cst_46 = arith.constant dense<0.000000e+00> : vector<2x96xf32>
    %177 = tpu.matmul %175, %1, %cst_46 {dimension_numbers = #tpu.dot_dimension_numbers<[1], [0], [0], [1], [0, 0, 1, 1], [], []>} : vector<2x32xf32>, vector<32x96xf32>, vector<2x96xf32> -> vector<2x96xf32>
    %178 = vector.broadcast %3 : vector<1x96xf32> to vector<2x96xf32>
    %179 = arith.addf %177, %178 : vector<2x96xf32>
    %180 = vector.extract_strided_slice %176 {offsets = [0, 0], sizes = [2, 64], strides = [1, 1]} : vector<2x96xf32> to vector<2x64xf32>
    %181 = vector.extract_strided_slice %179 {offsets = [0, 0], sizes = [2, 64], strides = [1, 1]} : vector<2x96xf32> to vector<2x64xf32>
    %182 = arith.addf %180, %181 : vector<2x64xf32>
    %183 = arith.negf %182 : vector<2x64xf32>
    %184 = math.exp %183 : vector<2x64xf32>
    %cst_47 = arith.constant 1.000000e+00 : f32
    %185 = vector.broadcast %cst_47 : f32 to vector<2x64xf32>
    %186 = arith.addf %185, %184 : vector<2x64xf32>
    %187 = arith.divf %185, %186 : vector<2x64xf32>
    %188 = vector.extract_strided_slice %187 {offsets = [0, 0], sizes = [2, 32], strides = [1, 1]} : vector<2x64xf32> to vector<2x32xf32>
    %189 = vector.extract_strided_slice %187 {offsets = [0, 32], sizes = [2, 32], strides = [1, 1]} : vector<2x64xf32> to vector<2x32xf32>
    %190 = vector.extract_strided_slice %176 {offsets = [0, 64], sizes = [2, 32], strides = [1, 1]} : vector<2x96xf32> to vector<2x32xf32>
    %191 = vector.extract_strided_slice %179 {offsets = [0, 64], sizes = [2, 32], strides = [1, 1]} : vector<2x96xf32> to vector<2x32xf32>
    %192 = arith.mulf %188, %191 : vector<2x32xf32>
    %193 = arith.addf %190, %192 : vector<2x32xf32>
    %194 = math.tanh %193 : vector<2x32xf32>
    %cst_48 = arith.constant 1.000000e+00 : f32
    %195 = vector.broadcast %cst_48 : f32 to vector<2x32xf32>
    %196 = arith.subf %195, %189 : vector<2x32xf32>
    %197 = arith.mulf %196, %194 : vector<2x32xf32>
    %198 = arith.mulf %189, %175 : vector<2x32xf32>
    %199 = arith.addf %197, %198 : vector<2x32xf32>
    %200 = vector.extract_strided_slice %30 {offsets = [14, 0], sizes = [2, 96], strides = [1, 1]} : vector<16x96xf32> to vector<2x96xf32>
    %cst_49 = arith.constant dense<0.000000e+00> : vector<2x96xf32>
    %201 = tpu.matmul %199, %1, %cst_49 {dimension_numbers = #tpu.dot_dimension_numbers<[1], [0], [0], [1], [0, 0, 1, 1], [], []>} : vector<2x32xf32>, vector<32x96xf32>, vector<2x96xf32> -> vector<2x96xf32>
    %202 = vector.broadcast %3 : vector<1x96xf32> to vector<2x96xf32>
    %203 = arith.addf %201, %202 : vector<2x96xf32>
    %204 = vector.extract_strided_slice %200 {offsets = [0, 0], sizes = [2, 64], strides = [1, 1]} : vector<2x96xf32> to vector<2x64xf32>
    %205 = vector.extract_strided_slice %203 {offsets = [0, 0], sizes = [2, 64], strides = [1, 1]} : vector<2x96xf32> to vector<2x64xf32>
    %206 = arith.addf %204, %205 : vector<2x64xf32>
    %207 = arith.negf %206 : vector<2x64xf32>
    %208 = math.exp %207 : vector<2x64xf32>
    %cst_50 = arith.constant 1.000000e+00 : f32
    %209 = vector.broadcast %cst_50 : f32 to vector<2x64xf32>
    %210 = arith.addf %209, %208 : vector<2x64xf32>
    %211 = arith.divf %209, %210 : vector<2x64xf32>
    %212 = vector.extract_strided_slice %211 {offsets = [0, 0], sizes = [2, 32], strides = [1, 1]} : vector<2x64xf32> to vector<2x32xf32>
    %213 = vector.extract_strided_slice %211 {offsets = [0, 32], sizes = [2, 32], strides = [1, 1]} : vector<2x64xf32> to vector<2x32xf32>
    %214 = vector.extract_strided_slice %200 {offsets = [0, 64], sizes = [2, 32], strides = [1, 1]} : vector<2x96xf32> to vector<2x32xf32>
    %215 = vector.extract_strided_slice %203 {offsets = [0, 64], sizes = [2, 32], strides = [1, 1]} : vector<2x96xf32> to vector<2x32xf32>
    %216 = arith.mulf %212, %215 : vector<2x32xf32>
    %217 = arith.addf %214, %216 : vector<2x32xf32>
    %218 = math.tanh %217 : vector<2x32xf32>
    %cst_51 = arith.constant 1.000000e+00 : f32
    %219 = vector.broadcast %cst_51 : f32 to vector<2x32xf32>
    %220 = arith.subf %219, %213 : vector<2x32xf32>
    %221 = arith.mulf %220, %218 : vector<2x32xf32>
    %222 = arith.mulf %213, %199 : vector<2x32xf32>
    %223 = arith.addf %221, %222 : vector<2x32xf32>
    %224 = vector.extract_strided_slice %55 {offsets = [0, 0], sizes = [1, 32], strides = [1, 1]} : vector<2x32xf32> to vector<1x32xf32>
    %225 = vector.extract_strided_slice %79 {offsets = [0, 0], sizes = [1, 32], strides = [1, 1]} : vector<2x32xf32> to vector<1x32xf32>
    %226 = vector.extract_strided_slice %103 {offsets = [0, 0], sizes = [1, 32], strides = [1, 1]} : vector<2x32xf32> to vector<1x32xf32>
    %227 = vector.extract_strided_slice %127 {offsets = [0, 0], sizes = [1, 32], strides = [1, 1]} : vector<2x32xf32> to vector<1x32xf32>
    %228 = vector.extract_strided_slice %151 {offsets = [0, 0], sizes = [1, 32], strides = [1, 1]} : vector<2x32xf32> to vector<1x32xf32>
    %229 = vector.extract_strided_slice %175 {offsets = [0, 0], sizes = [1, 32], strides = [1, 1]} : vector<2x32xf32> to vector<1x32xf32>
    %230 = vector.extract_strided_slice %199 {offsets = [0, 0], sizes = [1, 32], strides = [1, 1]} : vector<2x32xf32> to vector<1x32xf32>
    %231 = vector.extract_strided_slice %223 {offsets = [0, 0], sizes = [1, 32], strides = [1, 1]} : vector<2x32xf32> to vector<1x32xf32>
    %232 = tpu.concatenate %224, %225, %226, %227, %228, %229, %230, %231 in 0 : vector<1x32xf32>, vector<1x32xf32>, vector<1x32xf32>, vector<1x32xf32>, vector<1x32xf32>, vector<1x32xf32>, vector<1x32xf32>, vector<1x32xf32> -> vector<8x32xf32>
    %233 = vector.extract_strided_slice %55 {offsets = [1, 0], sizes = [1, 32], strides = [1, 1]} : vector<2x32xf32> to vector<1x32xf32>
    %234 = vector.extract_strided_slice %79 {offsets = [1, 0], sizes = [1, 32], strides = [1, 1]} : vector<2x32xf32> to vector<1x32xf32>
    %235 = vector.extract_strided_slice %103 {offsets = [1, 0], sizes = [1, 32], strides = [1, 1]} : vector<2x32xf32> to vector<1x32xf32>
    %236 = vector.extract_strided_slice %127 {offsets = [1, 0], sizes = [1, 32], strides = [1, 1]} : vector<2x32xf32> to vector<1x32xf32>
    %237 = vector.extract_strided_slice %151 {offsets = [1, 0], sizes = [1, 32], strides = [1, 1]} : vector<2x32xf32> to vector<1x32xf32>
    %238 = vector.extract_strided_slice %175 {offsets = [1, 0], sizes = [1, 32], strides = [1, 1]} : vector<2x32xf32> to vector<1x32xf32>
    %239 = vector.extract_strided_slice %199 {offsets = [1, 0], sizes = [1, 32], strides = [1, 1]} : vector<2x32xf32> to vector<1x32xf32>
    %240 = vector.extract_strided_slice %223 {offsets = [1, 0], sizes = [1, 32], strides = [1, 1]} : vector<2x32xf32> to vector<1x32xf32>
    %241 = tpu.concatenate %233, %234, %235, %236, %237, %238, %239, %240 in 0 : vector<1x32xf32>, vector<1x32xf32>, vector<1x32xf32>, vector<1x32xf32>, vector<1x32xf32>, vector<1x32xf32>, vector<1x32xf32>, vector<1x32xf32> -> vector<8x32xf32>
    %242 = tpu.concatenate %232, %241 in 0 : vector<8x32xf32>, vector<8x32xf32> -> vector<16x32xf32>
    %c0_52 = arith.constant 0 : index
    %c0_53 = arith.constant 0 : index
    %243 = vector.load %arg1[%c0_52, %c0_53] : memref<8x3xi32, #tpu.memory_space<vmem>>, vector<8x3xi32>
    %244 = tpu.iota {dimensions = array<i32: 1>} : vector<8x16xi32>
    %245 = vector.extract_strided_slice %243 {offsets = [0, 0], sizes = [8, 1], strides = [1, 1]} : vector<8x3xi32> to vector<8x1xi32>
    %246 = vector.broadcast %245 : vector<8x1xi32> to vector<8x16xi32>
    %247 = arith.cmpi eq, %244, %246 : vector<8x16xi32>
    %248 = arith.extui %247 : vector<8x16xi1> to vector<8x16xi32>
    %249 = arith.sitofp %248 : vector<8x16xi32> to vector<8x16xf32>
    %250 = vector.extract_strided_slice %243 {offsets = [0, 1], sizes = [8, 1], strides = [1, 1]} : vector<8x3xi32> to vector<8x1xi32>
    %251 = vector.broadcast %250 : vector<8x1xi32> to vector<8x16xi32>
    %252 = arith.cmpi eq, %244, %251 : vector<8x16xi32>
    %253 = arith.extui %252 : vector<8x16xi1> to vector<8x16xi32>
    %254 = arith.sitofp %253 : vector<8x16xi32> to vector<8x16xf32>
    %255 = arith.addf %249, %254 : vector<8x16xf32>
    %256 = vector.extract_strided_slice %243 {offsets = [0, 2], sizes = [8, 1], strides = [1, 1]} : vector<8x3xi32> to vector<8x1xi32>
    %257 = vector.broadcast %256 : vector<8x1xi32> to vector<8x16xi32>
    %258 = arith.cmpi eq, %244, %257 : vector<8x16xi32>
    %259 = arith.extui %258 : vector<8x16xi1> to vector<8x16xi32>
    %260 = arith.sitofp %259 : vector<8x16xi32> to vector<8x16xf32>
    %261 = arith.addf %255, %260 : vector<8x16xf32>
    %cst_54 = arith.constant 0.333333343 : f32
    %262 = vector.broadcast %cst_54 : f32 to vector<8x16xf32>
    %263 = arith.mulf %261, %262 : vector<8x16xf32>
    %cst_55 = arith.constant dense<0.000000e+00> : vector<8x32xf32>
    %264 = tpu.matmul %263, %242, %cst_55 {dimension_numbers = #tpu.dot_dimension_numbers<[1], [0], [0], [1], [0, 0, 1, 1], [], []>} : vector<8x16xf32>, vector<16x32xf32>, vector<8x32xf32> -> vector<8x32xf32>
    %c0_56 = arith.constant 0 : index
    %c0_57 = arith.constant 0 : index
    %265 = vector.load %arg2[%c0_56, %c0_57] : memref<14x4xf32, #tpu.memory_space<vmem>>, vector<14x4xf32>
    %cst_58 = arith.constant dense<0.000000e+00> : vector<14x32xf32>
    %266 = tpu.matmul %265, %5, %cst_58 {dimension_numbers = #tpu.dot_dimension_numbers<[1], [0], [0], [1], [0, 0, 1, 1], [], []>} : vector<14x4xf32>, vector<4x32xf32>, vector<14x32xf32> -> vector<14x32xf32>
    %267 = vector.broadcast %6 : vector<1x32xf32> to vector<14x32xf32>
    %268 = arith.addf %266, %267 : vector<14x32xf32>
    %cst_59 = arith.constant 0.000000e+00 : f32
    %269 = vector.broadcast %cst_59 : f32 to vector<14x32xf32>
    %270 = arith.maximumf %268, %269 : vector<14x32xf32>
    %271 = vector.extract_strided_slice %242 {offsets = [0, 0], sizes = [8, 32], strides = [1, 1]} : vector<16x32xf32> to vector<8x32xf32>
    %272 = vector.extract_strided_slice %264 {offsets = [0, 0], sizes = [4, 32], strides = [1, 1]} : vector<8x32xf32> to vector<4x32xf32>
    %273 = vector.extract_strided_slice %242 {offsets = [8, 0], sizes = [8, 32], strides = [1, 1]} : vector<16x32xf32> to vector<8x32xf32>
    %274 = vector.extract_strided_slice %264 {offsets = [4, 0], sizes = [4, 32], strides = [1, 1]} : vector<8x32xf32> to vector<4x32xf32>
    %275 = tpu.concatenate %271, %272, %273, %274 in 0 : vector<8x32xf32>, vector<4x32xf32>, vector<8x32xf32>, vector<4x32xf32> -> vector<24x32xf32>
    %cst_60 = arith.constant dense<0.000000e+00> : vector<24x32xf32>
    %276 = tpu.matmul %275, %7, %cst_60 {dimension_numbers = #tpu.dot_dimension_numbers<[1], [0], [0], [1], [0, 0, 1, 1], [], []>} : vector<24x32xf32>, vector<32x32xf32>, vector<24x32xf32> -> vector<24x32xf32>
    %cst_61 = arith.constant dense<0.000000e+00> : vector<14x32xf32>
    %277 = tpu.matmul %270, %8, %cst_61 {dimension_numbers = #tpu.dot_dimension_numbers<[1], [0], [0], [1], [0, 0, 1, 1], [], []>} : vector<14x32xf32>, vector<32x32xf32>, vector<14x32xf32> -> vector<14x32xf32>
    %278 = vector.extract_strided_slice %276 {offsets = [0, 0], sizes = [12, 32], strides = [1, 1]} : vector<24x32xf32> to vector<12x32xf32>
    %279 = vector.extract_strided_slice %277 {offsets = [0, 0], sizes = [1, 32], strides = [1, 1]} : vector<14x32xf32> to vector<1x32xf32>
    %280 = vector.broadcast %279 : vector<1x32xf32> to vector<12x32xf32>
    %281 = arith.addf %278, %280 : vector<12x32xf32>
    %282 = vector.extract_strided_slice %277 {offsets = [1, 0], sizes = [1, 32], strides = [1, 1]} : vector<14x32xf32> to vector<1x32xf32>
    %283 = vector.broadcast %282 : vector<1x32xf32> to vector<12x32xf32>
    %284 = arith.addf %278, %283 : vector<12x32xf32>
    %285 = vector.extract_strided_slice %277 {offsets = [2, 0], sizes = [1, 32], strides = [1, 1]} : vector<14x32xf32> to vector<1x32xf32>
    %286 = vector.broadcast %285 : vector<1x32xf32> to vector<12x32xf32>
    %287 = arith.addf %278, %286 : vector<12x32xf32>
    %288 = vector.extract_strided_slice %277 {offsets = [3, 0], sizes = [1, 32], strides = [1, 1]} : vector<14x32xf32> to vector<1x32xf32>
    %289 = vector.broadcast %288 : vector<1x32xf32> to vector<12x32xf32>
    %290 = arith.addf %278, %289 : vector<12x32xf32>
    %291 = vector.extract_strided_slice %277 {offsets = [4, 0], sizes = [1, 32], strides = [1, 1]} : vector<14x32xf32> to vector<1x32xf32>
    %292 = vector.broadcast %291 : vector<1x32xf32> to vector<12x32xf32>
    %293 = arith.addf %278, %292 : vector<12x32xf32>
    %294 = vector.extract_strided_slice %277 {offsets = [5, 0], sizes = [1, 32], strides = [1, 1]} : vector<14x32xf32> to vector<1x32xf32>
    %295 = vector.broadcast %294 : vector<1x32xf32> to vector<12x32xf32>
    %296 = arith.addf %278, %295 : vector<12x32xf32>
    %297 = vector.extract_strided_slice %277 {offsets = [6, 0], sizes = [1, 32], strides = [1, 1]} : vector<14x32xf32> to vector<1x32xf32>
    %298 = vector.broadcast %297 : vector<1x32xf32> to vector<12x32xf32>
    %299 = arith.addf %278, %298 : vector<12x32xf32>
    %300 = vector.extract_strided_slice %276 {offsets = [12, 0], sizes = [12, 32], strides = [1, 1]} : vector<24x32xf32> to vector<12x32xf32>
    %301 = vector.extract_strided_slice %277 {offsets = [7, 0], sizes = [1, 32], strides = [1, 1]} : vector<14x32xf32> to vector<1x32xf32>
    %302 = vector.broadcast %301 : vector<1x32xf32> to vector<12x32xf32>
    %303 = arith.addf %300, %302 : vector<12x32xf32>
    %304 = vector.extract_strided_slice %277 {offsets = [8, 0], sizes = [1, 32], strides = [1, 1]} : vector<14x32xf32> to vector<1x32xf32>
    %305 = vector.broadcast %304 : vector<1x32xf32> to vector<12x32xf32>
    %306 = arith.addf %300, %305 : vector<12x32xf32>
    %307 = vector.extract_strided_slice %277 {offsets = [9, 0], sizes = [1, 32], strides = [1, 1]} : vector<14x32xf32> to vector<1x32xf32>
    %308 = vector.broadcast %307 : vector<1x32xf32> to vector<12x32xf32>
    %309 = arith.addf %300, %308 : vector<12x32xf32>
    %310 = vector.extract_strided_slice %277 {offsets = [10, 0], sizes = [1, 32], strides = [1, 1]} : vector<14x32xf32> to vector<1x32xf32>
    %311 = vector.broadcast %310 : vector<1x32xf32> to vector<12x32xf32>
    %312 = arith.addf %300, %311 : vector<12x32xf32>
    %313 = vector.extract_strided_slice %277 {offsets = [11, 0], sizes = [1, 32], strides = [1, 1]} : vector<14x32xf32> to vector<1x32xf32>
    %314 = vector.broadcast %313 : vector<1x32xf32> to vector<12x32xf32>
    %315 = arith.addf %300, %314 : vector<12x32xf32>
    %316 = vector.extract_strided_slice %277 {offsets = [12, 0], sizes = [1, 32], strides = [1, 1]} : vector<14x32xf32> to vector<1x32xf32>
    %317 = vector.broadcast %316 : vector<1x32xf32> to vector<12x32xf32>
    %318 = arith.addf %300, %317 : vector<12x32xf32>
    %319 = vector.extract_strided_slice %277 {offsets = [13, 0], sizes = [1, 32], strides = [1, 1]} : vector<14x32xf32> to vector<1x32xf32>
    %320 = vector.broadcast %319 : vector<1x32xf32> to vector<12x32xf32>
    %321 = arith.addf %300, %320 : vector<12x32xf32>
    %322 = tpu.concatenate %281, %284, %287, %290, %293, %296, %299, %303, %306, %309, %312, %315, %318, %321 in 0 : vector<12x32xf32>, vector<12x32xf32>, vector<12x32xf32>, vector<12x32xf32>, vector<12x32xf32>, vector<12x32xf32>, vector<12x32xf32>, vector<12x32xf32>, vector<12x32xf32>, vector<12x32xf32>, vector<12x32xf32>, vector<12x32xf32>, vector<12x32xf32>, vector<12x32xf32> -> vector<168x32xf32>
    %323 = vector.broadcast %9 : vector<1x32xf32> to vector<168x32xf32>
    %324 = arith.addf %322, %323 : vector<168x32xf32>
    %325 = math.tanh %324 : vector<168x32xf32>
    %cst_62 = arith.constant dense<0.000000e+00> : vector<168x32xf32>
    %326 = tpu.matmul %325, %10, %cst_62 {dimension_numbers = #tpu.dot_dimension_numbers<[1], [0], [0], [1], [0, 0, 1, 1], [], []>} : vector<168x32xf32>, vector<32x32xf32>, vector<168x32xf32> -> vector<168x32xf32>
    %327 = vector.broadcast %11 : vector<1x32xf32> to vector<168x32xf32>
    %328 = arith.addf %326, %327 : vector<168x32xf32>
    %329 = math.tanh %328 : vector<168x32xf32>
    %330 = vector.broadcast %12 : vector<1x32xf32> to vector<168x32xf32>
    %331 = arith.mulf %329, %330 : vector<168x32xf32>
    %cst_63 = arith.constant dense<0.000000e+00> : vector<168xf32>
    %332 = vector.multi_reduction <add>, %331, %cst_63 [1] : vector<168x32xf32> to vector<168xf32>
    %333 = vector.shape_cast %332 : vector<168xf32> to vector<168x1xf32>
    %334 = vector.broadcast %13 : vector<1x1xf32> to vector<168x1xf32>
    %335 = arith.addf %333, %334 : vector<168x1xf32>
    %336 = vector.extract_strided_slice %335 {offsets = [0, 0], sizes = [12, 1], strides = [1, 1]} : vector<168x1xf32> to vector<12x1xf32>
    %337 = vector.extract_strided_slice %335 {offsets = [12, 0], sizes = [12, 1], strides = [1, 1]} : vector<168x1xf32> to vector<12x1xf32>
    %338 = vector.extract_strided_slice %335 {offsets = [24, 0], sizes = [12, 1], strides = [1, 1]} : vector<168x1xf32> to vector<12x1xf32>
    %339 = vector.extract_strided_slice %335 {offsets = [36, 0], sizes = [12, 1], strides = [1, 1]} : vector<168x1xf32> to vector<12x1xf32>
    %340 = vector.extract_strided_slice %335 {offsets = [48, 0], sizes = [12, 1], strides = [1, 1]} : vector<168x1xf32> to vector<12x1xf32>
    %341 = vector.extract_strided_slice %335 {offsets = [60, 0], sizes = [12, 1], strides = [1, 1]} : vector<168x1xf32> to vector<12x1xf32>
    %342 = vector.extract_strided_slice %335 {offsets = [72, 0], sizes = [12, 1], strides = [1, 1]} : vector<168x1xf32> to vector<12x1xf32>
    %343 = tpu.concatenate %336, %337, %338, %339, %340, %341, %342 in 1 : vector<12x1xf32>, vector<12x1xf32>, vector<12x1xf32>, vector<12x1xf32>, vector<12x1xf32>, vector<12x1xf32>, vector<12x1xf32> -> vector<12x7xf32>
    %344 = vector.extract_strided_slice %343 {offsets = [0, 0], sizes = [8, 7], strides = [1, 1]} : vector<12x7xf32> to vector<8x7xf32>
    %345 = vector.extract_strided_slice %343 {offsets = [8, 0], sizes = [3, 7], strides = [1, 1]} : vector<12x7xf32> to vector<3x7xf32>
    %346 = vector.extract_strided_slice %343 {offsets = [11, 0], sizes = [1, 7], strides = [1, 1]} : vector<12x7xf32> to vector<1x7xf32>
    %cst_64 = arith.constant dense<0xFF800000> : vector<8xf32>
    %347 = vector.multi_reduction <maximumf>, %344, %cst_64 [1] : vector<8x7xf32> to vector<8xf32>
    %348 = vector.shape_cast %347 : vector<8xf32> to vector<8x1xf32>
    %349 = vector.broadcast %348 : vector<8x1xf32> to vector<8x7xf32>
    %350 = arith.subf %344, %349 : vector<8x7xf32>
    %351 = math.exp %350 : vector<8x7xf32>
    %cst_65 = arith.constant dense<0.000000e+00> : vector<8xf32>
    %352 = vector.multi_reduction <add>, %351, %cst_65 [1] : vector<8x7xf32> to vector<8xf32>
    %353 = vector.shape_cast %352 : vector<8xf32> to vector<8x1xf32>
    %354 = vector.broadcast %353 : vector<8x1xf32> to vector<8x7xf32>
    %355 = arith.divf %351, %354 : vector<8x7xf32>
    %356 = vector.extract_strided_slice %270 {offsets = [0, 0], sizes = [7, 32], strides = [1, 1]} : vector<14x32xf32> to vector<7x32xf32>
    %cst_66 = arith.constant dense<0.000000e+00> : vector<8x32xf32>
    %357 = tpu.matmul %355, %356, %cst_66 {dimension_numbers = #tpu.dot_dimension_numbers<[1], [0], [0], [1], [0, 0, 1, 1], [], []>} : vector<8x7xf32>, vector<7x32xf32>, vector<8x32xf32> -> vector<8x32xf32>
    %358 = vector.extract_strided_slice %335 {offsets = [84, 0], sizes = [12, 1], strides = [1, 1]} : vector<168x1xf32> to vector<12x1xf32>
    %359 = vector.extract_strided_slice %335 {offsets = [96, 0], sizes = [12, 1], strides = [1, 1]} : vector<168x1xf32> to vector<12x1xf32>
    %360 = vector.extract_strided_slice %335 {offsets = [108, 0], sizes = [12, 1], strides = [1, 1]} : vector<168x1xf32> to vector<12x1xf32>
    %361 = vector.extract_strided_slice %335 {offsets = [120, 0], sizes = [12, 1], strides = [1, 1]} : vector<168x1xf32> to vector<12x1xf32>
    %362 = vector.extract_strided_slice %335 {offsets = [132, 0], sizes = [12, 1], strides = [1, 1]} : vector<168x1xf32> to vector<12x1xf32>
    %363 = vector.extract_strided_slice %335 {offsets = [144, 0], sizes = [12, 1], strides = [1, 1]} : vector<168x1xf32> to vector<12x1xf32>
    %364 = vector.extract_strided_slice %335 {offsets = [156, 0], sizes = [12, 1], strides = [1, 1]} : vector<168x1xf32> to vector<12x1xf32>
    %365 = tpu.concatenate %358, %359, %360, %361, %362, %363, %364 in 1 : vector<12x1xf32>, vector<12x1xf32>, vector<12x1xf32>, vector<12x1xf32>, vector<12x1xf32>, vector<12x1xf32>, vector<12x1xf32> -> vector<12x7xf32>
    %366 = vector.extract_strided_slice %365 {offsets = [0, 0], sizes = [8, 7], strides = [1, 1]} : vector<12x7xf32> to vector<8x7xf32>
    %367 = vector.extract_strided_slice %365 {offsets = [8, 0], sizes = [3, 7], strides = [1, 1]} : vector<12x7xf32> to vector<3x7xf32>
    %368 = vector.extract_strided_slice %365 {offsets = [11, 0], sizes = [1, 7], strides = [1, 1]} : vector<12x7xf32> to vector<1x7xf32>
    %cst_67 = arith.constant dense<0xFF800000> : vector<8xf32>
    %369 = vector.multi_reduction <maximumf>, %366, %cst_67 [1] : vector<8x7xf32> to vector<8xf32>
    %370 = vector.shape_cast %369 : vector<8xf32> to vector<8x1xf32>
    %371 = vector.broadcast %370 : vector<8x1xf32> to vector<8x7xf32>
    %372 = arith.subf %366, %371 : vector<8x7xf32>
    %373 = math.exp %372 : vector<8x7xf32>
    %cst_68 = arith.constant dense<0.000000e+00> : vector<8xf32>
    %374 = vector.multi_reduction <add>, %373, %cst_68 [1] : vector<8x7xf32> to vector<8xf32>
    %375 = vector.shape_cast %374 : vector<8xf32> to vector<8x1xf32>
    %376 = vector.broadcast %375 : vector<8x1xf32> to vector<8x7xf32>
    %377 = arith.divf %373, %376 : vector<8x7xf32>
    %378 = vector.extract_strided_slice %270 {offsets = [7, 0], sizes = [7, 32], strides = [1, 1]} : vector<14x32xf32> to vector<7x32xf32>
    %cst_69 = arith.constant dense<0.000000e+00> : vector<8x32xf32>
    %379 = tpu.matmul %377, %378, %cst_69 {dimension_numbers = #tpu.dot_dimension_numbers<[1], [0], [0], [1], [0, 0, 1, 1], [], []>} : vector<8x7xf32>, vector<7x32xf32>, vector<8x32xf32> -> vector<8x32xf32>
    %380 = tpu.concatenate %357, %379 in 0 : vector<8x32xf32>, vector<8x32xf32> -> vector<16x32xf32>
    %cst_70 = arith.constant dense<0.000000e+00> : vector<16x32xf32>
    %381 = tpu.matmul %242, %14, %cst_70 {dimension_numbers = #tpu.dot_dimension_numbers<[1], [0], [0], [1], [0, 0, 1, 1], [], []>} : vector<16x32xf32>, vector<32x32xf32>, vector<16x32xf32> -> vector<16x32xf32>
    %cst_71 = arith.constant dense<0.000000e+00> : vector<16x32xf32>
    %382 = tpu.matmul %380, %15, %cst_71 {dimension_numbers = #tpu.dot_dimension_numbers<[1], [0], [0], [1], [0, 0, 1, 1], [], []>} : vector<16x32xf32>, vector<32x32xf32>, vector<16x32xf32> -> vector<16x32xf32>
    %383 = arith.addf %381, %382 : vector<16x32xf32>
    %384 = vector.broadcast %16 : vector<1x32xf32> to vector<16x32xf32>
    %385 = arith.addf %383, %384 : vector<16x32xf32>
    %386 = math.tanh %385 : vector<16x32xf32>
    %cst_72 = arith.constant dense<0.000000e+00> : vector<16x64xf32>
    %387 = tpu.matmul %386, %4, %cst_72 {dimension_numbers = #tpu.dot_dimension_numbers<[1], [1], [0], [0], [0, 0, 1, 0], [], []>} : vector<16x32xf32>, vector<64x32xf32>, vector<16x64xf32> -> vector<16x64xf32>
    %388 = vector.extract_strided_slice %264 {offsets = [0, 0], sizes = [3, 32], strides = [1, 1]} : vector<8x32xf32> to vector<3x32xf32>
    %389 = vector.extract_strided_slice %264 {offsets = [4, 0], sizes = [3, 32], strides = [1, 1]} : vector<8x32xf32> to vector<3x32xf32>
    %390 = tpu.concatenate %388, %389 in 0 : vector<3x32xf32>, vector<3x32xf32> -> vector<6x32xf32>
    %cst_73 = arith.constant dense<0.000000e+00> : vector<6x32xf32>
    %391 = tpu.matmul %390, %17, %cst_73 {dimension_numbers = #tpu.dot_dimension_numbers<[1], [0], [0], [1], [0, 0, 1, 1], [], []>} : vector<6x32xf32>, vector<32x32xf32>, vector<6x32xf32> -> vector<6x32xf32>
    %392 = vector.broadcast %18 : vector<1x32xf32> to vector<6x32xf32>
    %393 = arith.addf %391, %392 : vector<6x32xf32>
    %394 = math.tanh %393 : vector<6x32xf32>
    %cst_74 = arith.constant dense<0.000000e+00> : vector<6x32xf32>
    %395 = tpu.matmul %394, %19, %cst_74 {dimension_numbers = #tpu.dot_dimension_numbers<[1], [0], [0], [1], [0, 0, 1, 1], [], []>} : vector<6x32xf32>, vector<32x32xf32>, vector<6x32xf32> -> vector<6x32xf32>
    %396 = vector.broadcast %20 : vector<1x32xf32> to vector<6x32xf32>
    %397 = arith.addf %395, %396 : vector<6x32xf32>
    %398 = tpu.concatenate %345, %367 in 0 : vector<3x7xf32>, vector<3x7xf32> -> vector<6x7xf32>
    %399 = tpu.concatenate %346, %368 in 0 : vector<1x7xf32>, vector<1x7xf32> -> vector<2x7xf32>
    %cst_75 = arith.constant 0.000000e+00 : f32
    %400 = vector.broadcast %cst_75 : f32 to vector<6x1xf32>
    %cst_76 = arith.constant 0.000000e+00 : f32
    %401 = vector.broadcast %cst_76 : f32 to vector<6x24xf32>
    %402 = tpu.concatenate %398, %400, %397, %401 in 1 : vector<6x7xf32>, vector<6x1xf32>, vector<6x32xf32>, vector<6x24xf32> -> vector<6x64xf32>
    %cst_77 = arith.constant 0.000000e+00 : f32
    %403 = vector.broadcast %cst_77 : f32 to vector<2x57xf32>
    %404 = tpu.concatenate %399, %403 in 1 : vector<2x7xf32>, vector<2x57xf32> -> vector<2x64xf32>
    %405 = tpu.concatenate %387, %402, %404 in 0 : vector<16x64xf32>, vector<6x64xf32>, vector<2x64xf32> -> vector<24x64xf32>
    %c0_78 = arith.constant 0 : index
    %c0_79 = arith.constant 0 : index
    %406 = vector.load %arg5[%c0_78, %c0_79] : memref<24x64xf32, #tpu.memory_space<vmem>>, vector<24x64xf32>
    tpu.vector_store %arg5[%c0_78, %c0_79], %405 {strides = array<i32>} : memref<24x64xf32, #tpu.memory_space<vmem>>, vector<24x64xf32>,
    return
  }
}

</mosaic_0001>

<bundles_post_ra>
// kernel: forward.1
= control target key start
LH: loop header
LB: loop body
LE: loop exit
PB: predicated region body
PF: predicated region fallthrough
CT: control target
= control target key end

     0   :  { %v3705_v0 = vmov 0   ;;  %v77_v21 = vlaneseq  ;;  %vm91_vm0 = vcmask 523264   ;;  %v3706_v24 = vmov 0.0   ;;  %s3709_s7 = smov 64   ;;  %s3713_s13 = smov 32   ;;  %s4608_s0 = inlined_call_operand.vmem [shape: s32[16,1], index: 0, kind: input, shape index: {}]   ;;  %s4609_s4 = inlined_call_operand.vmem [shape: f32[360,32], index: 4, kind: input, shape index: {}]   ;;  %s4610_s3 = inlined_call_operand.vmem [shape: f32[80,96], index: 3, kind: input, shape index: {}]   ;;  %s4611_s2 = inlined_call_operand.vmem [shape: f32[14,4], index: 2, kind: input, shape index: {}]   ;;  %s4612_s1 = inlined_call_operand.vmem [shape: s32[8,3], index: 1, kind: input, shape index: {}]   ;;  %s4613_s5 = inlined_call_operand.vmem [shape: f32[24,64], index: 5, kind: output, shape index: {}]  }
   0x1   :  { %3550 = vset.pattern.permute.xlu0 %v3705_v0  ;;  %v75_v1 = vld [vmem:[%s4608_s0] sm:$0xff]  ;;  %3551 = vset.pattern.permute.xlu1 %v3705_v0  ;;  %v31_v3 = vld [vmem:[%s4609_s4 + $0x8] sm:$0xff]  ;;  %v32_v4 = vld [vmem:[%s4609_s4 + $0x10] sm:$0xff]  ;;  %v3707_v31 = vmov 0.0|0.0   ;;  %vm3708_vm3 = vmmov 0   ;;  %vm177_vm4 = vcmask 261120  }
   0x2   :  { %v30_v2 = vld [vmem:[%s4609_s4] sm:$0xff]  ;;  %80 = vperm.xlu0 %3550, %v75_v1   ;;  %v33_v5 = vld [vmem:[%s4609_s4 + $0x18] sm:$0xff]  ;;  %v76_v6 = vld [vmem:[%s4608_s0 + $0x8] sm:$0xff]  ;;  %v3810_v22 = vand.u32 127, %v77_v21  ;;  %vm1112_vm5 = vcmask 1040384   ;;  %vm1114_vm6 = vcmask 1041408  }
   0x3   :  { %v3769_v7 = vpack.c.bf16 %v31_v3, %v30_v2  ;;  %v3771_v8 = vpack.c.bf16 %v33_v5, %v32_v4  ;;  %v34_v9 = vld [vmem:[%s4609_s4 + $0x20] sm:$0xff]  ;;  %v35_v10 = vld [vmem:[%s4609_s4 + $0x28] sm:$0xff]  ;;  %v36_v12 = vld [vmem:[%s4609_s4 + $0x30] sm:$0xff]  ;;  %vm1116_vm7 = vcmask 1042432   ;;  %vm1118_vm8 = vcmask 1043456   ;;  %s3714_s19 = smov 1  }
   0x4   :  { %v3782_v11 = vpack.c.bf16 %v35_v10, %v34_v9  ;;  %v37_v13 = vld [vmem:[%s4609_s4 + $0x38] sm:$0xff]  ;;  %v20_v14 = vld [vmem:[%s4610_s3] sm:$0xff]  ;;  %v21_v15 = vld [vmem:[%s4610_s3 + $0x8] sm:$0xff]  ;;  %vm1120_vm9 = vcmask 1044480   ;;  %vm4614_vm10 = vcmask 1045504   ;;  %vm1254_vm11 = vcmask 31744  }
   0x5   :  { %3386 = vmatprep.subr.bf16.mxu0 %v3769_v7  ;;  %v22_v16 = vld [vmem:[%s4610_s3 + $0x10] sm:$0xff]  ;;  %v3401_v17 = vpack.c.bf16 %v21_v15, %v20_v14  ;;  %v23_v18 = vld [vmem:[%s4610_s3 + $0x18] sm:$0xff]  ;;  %v3804_v19 = vpack.c.bf16 %v37_v13, %v36_v12  ;;  %v24_v28 = vld [vmem:[%s4610_s3 + $0x20] sm:$0xff]  ;;  %vm1124_vm12 = vcmask 1046528   ;;  %s3715_s20 = smov 2   ;;  %s3716_s21 = smov 3  }
   0x6   :  { %83 = vperm.xlu0 %3550, %v76_v6   ;;  %3388 = vmatpush3.bf16.msra.mxu0 %v3769_v7  ;;  %v3405_v20 = vpack.c.bf16 %v23_v18, %v22_v16  ;;  %v25_v29 = vld [vmem:[%s4610_s3 + $0x28] sm:$0xff]  ;;  %v26_v32 = vld [vmem:[%s4610_s3 + $0x30] sm:$0xff]  ;;  %v27_v33 = vld [vmem:[%s4610_s3 + $0x38] sm:$0xff]  ;;  %s3717_s22 = smov 4   ;;  %s3718_s23 = smov 5  }
   0x7   :  { %3390 = vmatprep.subr.bf16.mxu0 %v3771_v8  ;;  %3402 = vmatprep.subr.bf16.mxu1 %v3401_v17  ;;  %v3824_v30 = vpack.c.bf16 %v25_v29, %v24_v28  ;;  %v3836_v34 = vpack.c.bf16 %v27_v33, %v26_v32  ;;  %v2867_v37 = vld [vmem:[%s4610_s3 + $0x40] ss:$0 sm:$0xff]  ;;  %v3865_v41 = vld [vmem:[%s4610_s3 + $0x48] ss:$0 sm:$0xff]  ;;  %s3710_s3 = smov 96   ;;  %s3719_s24 = smov 6  }
   0x8   :  { %3404 = vmatpush3.bf16.msra.mxu1 %v3401_v17  ;;  %s3720_s12 = smov 8  }
   0x9   :  { %3406 = vmatprep.subr.bf16.mxu1 %v3405_v20 }
   0xa   :  { %3392 = vmatpush3.bf16.msra.mxu0 %v3771_v8 }
   0xb   :  { %3394 = vmatprep.subr.bf16.mxu0 %v3782_v11 }
   0xc   :  { %3408 = vmatpush3.bf16.msra.mxu1 %v3405_v20 }
   0xd   :  { %3409 = vmatprep.subr.bf16.mxu1 %v3707_v31 }
   0xe   :  { %3396 = vmatpush3.bf16.msra.mxu0 %v3782_v11 }
   0xf   :  { %3398 = vmatprep.subr.bf16.mxu0 %v3804_v19 }
  0x12   :  { %3400 = vmatpush3.bf16.msra.mxu0 %v3804_v19 }
  0x13   :  { %3415 = vmatprep.subr.bf16.mxu0 %v3707_v31 }
  0x81   :  { %v81_v23 = vpop.permute.xlu0 %80 }
  0x82   :  { %vm85_vm1 = vcmp.eq.s32.totalorder %v3810_v22, %v81_v23 }
  0x83   :  { %v2863_v25 = vsel %vm85_vm1, 1.0, %v3706_v24  ;;  %vm1174_vm1 = vcmask 130048  }
  0x84   :  { %3099 = vmatprep.mubr.msk.f32.mxu0 %vm91_vm0, %v2863_v25 }
  0x85   :  { %v84_v26 = vpop.permute.xlu0 %83 }
  0x86   :  { %vm86_vm2 = vcmp.eq.s32.totalorder %v3810_v22, %v84_v26 }
  0x87   :  { %v2864_v27 = vsel %vm86_vm2, 1.0, %v3706_v24  ;;  %vm2127_vm2 = vcmask 7168  }
  0x88   :  { %3100 = vmatmul.mubr.msk.f32.vlgmr.msra.gmra.mrb[0].mxu0 %vm91_vm0, %v2864_v27 }
  0x89   :  { %3417 = vmatpush3.bf16.msra.mxu0 %v3824_v30  ;;  %3132 = vmatprep.mubr.msk.f32.mxu0 %vm3708_vm3, %v3706_v24 }
  0x8a   :  { %3418 = vmatprep.subr.bf16.mxu0 %v3707_v31 }
  0x8d   :  { %3420 = vmatpush3.bf16.msra.mxu0 %v3836_v34 }
  0x8e   :  { %3427 = vmatprep.subr.bf16.mxu0 %v3707_v31 }
 0x15b   :  { %v3101_v35 = vpop.f32.mrb[0].mxu0 }
 0x15c   :  { %v164_v36 = vpop.f32.mrb[1].mxu0 }
 0x15d   :  { %3110 = vmatprep.mubr.msk.f32.mxu1 %vm177_vm4, %v164_v36 }
 0x15e   :  { %3111 = vmatmul.mubr.msk.f32.vlgmr.msra.gmra.mrb[0].mxu1 %vm177_vm4, %v3101_v35 }
 0x15f   :  { %3411 = vmatpush3.bf16.msra.mxu1 %v3824_v30  ;;  %3121 = vmatprep.mubr.msk.f32.mxu1 %vm3708_vm3, %v3706_v24 }
 0x160   :  { %3412 = vmatprep.subr.bf16.mxu1 %v3707_v31 }
 0x163   :  { %3414 = vmatpush3.bf16.msra.mxu1 %v3836_v34 }
 0x164   :  { %3421 = vmatprep.subr.bf16.mxu1 %v3707_v31 }
 0x166   :  { %3122 = vmatmul.mubr.f32.vlgmr.msra.gmra.mrb[2].mxu1 %v3706_v24 }
 0x167   :  { %3423 = vmatpush3.bf16.msra.mxu1 %v3824_v30  ;;  %3143 = vmatprep.mubr.msk.f32.mxu1 %vm3708_vm3, %v3706_v24 }
 0x168   :  { %3424 = vmatprep.subr.bf16.mxu1 %v3707_v31 }
 0x16b   :  { %3426 = vmatpush3.bf16.msra.mxu1 %v3836_v34 }
 0x16c   :  { %3433 = vmatprep.subr.bf16.mxu1 %v3707_v31 }
 0x231   :  { %v3112_v38 = vpop.f32.mrb[0].mxu1 }
 0x232   :  { %v3860_v39 = vadd.f32 %v3112_v38, %v2867_v37  ;;  %v250_v40 = vpop.f32.mrb[1].mxu1 }
 0x233   :  { %v3869_v45 = vadd.f32 %v2867_v37, %v250_v40 }
 0x239   :  { %v332_v42 = vpop.f32.mrb[2].mxu1 }
 0x23a   :  { %v333_v43 = vadd.f32 %v3865_v41, %v332_v42  ;;  %v3123_v44 = vpop.f32.mrb[3].mxu1 }
 0x23c   :  { %344 = vrot.lane.b32.xlu1 %v333_v43, %s3709_s7  ;;  %v336_v46 = vadd.f32 %v333_v43, %v3869_v45 }
 0x23e   :  { %v2871_v47 = vmul.f32 -1.442695, %v336_v46 }
 0x240   :  { %3555 = vpow2.f32 %v2871_v47 }
 0x24a   :  { %v3556_v48 = vpop.eup %3555 }
 0x24b   :  { %v340_v49 = vadd.f32 1.0, %v3556_v48 }
 0x24d   :  { %3557 = vrcp.f32 %v340_v49 }
 0x257   :  { %v3558_v50 = vpop.eup %3557 }
 0x258   :  { %v354_v56 = vsub.f32 1.0, %v3558_v50  ;;  %v360_v58 = vmul.f32 0.0, %v3558_v50 }
 0x2ae   :  { %v345_v51 = vpop.permute.xlu1 %344 }
 0x2af   :  { %v347_v52 = vmul.f32 %v3558_v50, %v345_v51 }
 0x2b1   :  { %349 = vrot.lane.b32.xlu1 %v347_v52, %s3709_s7 }
 0x323   :  { %v350_v53 = vpop.permute.xlu1 %349 }
 0x324   :  { %v352_v54 = vadd.f32 %v350_v53, %v3869_v45 }
 0x326   :  { %3559 = vtanh.f32 %v352_v54 }
 0x330   :  { %v3560_v55 = vpop.eup %3559 }
 0x331   :  { %356 = vrot.lane.b32.xlu0 %v3560_v55, %s3710_s3 }
 0x3a3   :  { %v357_v57 = vpop.permute.xlu0 %356 }
 0x3a4   :  { %v359_v59 = vmul.f32 %v357_v57, %v354_v56 }
 0x3a6   :  { %v3875_v60 = vadd.f32 %v360_v58, %v359_v59 }
 0x3a8   :  { %363 = vrot.lane.b32.xlu1 %v3875_v60, %s3710_s3  ;;  %v463_v16 = vrot.slane %v3875_v60, 6  ;;  %v1126_v54 = vrot.slane %v3875_v60, 1 }
 0x41a   :  { %v364_v61 = vpop.permute.xlu1 %363 }
 0x41b   :  { %3133 = vmatmul.mubr.msk.f32.vlgmr.msra.gmra.mrb[2].mxu0 %vm177_vm4, %v364_v61 }
 0x41c   :  { %3429 = vmatpush3.bf16.msra.mxu0 %v3824_v30  ;;  %3154 = vmatprep.mubr.msk.f32.mxu0 %vm3708_vm3, %v3706_v24 }
 0x41d   :  { %3430 = vmatprep.subr.bf16.mxu0 %v3707_v31 }
 0x420   :  { %3432 = vmatpush3.bf16.msra.mxu0 %v3836_v34 }
 0x421   :  { %3439 = vmatprep.subr.bf16.mxu0 %v3707_v31 }
 0x4ee   :  { %v433_v62 = vpop.f32.mrb[2].mxu0 }
 0x4ef   :  { %v434_v63 = vadd.f32 %v3865_v41, %v433_v62  ;;  %v3134_v0 = vpop.f32.mrb[3].mxu0 }
 0x4f1   :  { %v438_v1 = vrot.slane %v434_v63, 6 }
 0x4f3   :  { %447 = vrot.lane.b32.xlu0 %v438_v1, %s3709_s7  ;;  %v440_v2 = vadd.f32 %v438_v1, %v3869_v45 }
 0x4f5   :  { %v2873_v3 = vmul.f32 -1.442695, %v440_v2 }
 0x4f7   :  { %3561 = vpow2.f32 %v2873_v3 }
 0x501   :  { %v3562_v4 = vpop.eup %3561 }
 0x502   :  { %v444_v5 = vadd.f32 1.0, %v3562_v4 }
 0x504   :  { %3563 = vrcp.f32 %v444_v5 }
 0x50e   :  { %v3564_v6 = vpop.eup %3563 }
 0x50f   :  { %v457_v15 = vsub.f32 1.0, %v3564_v6  ;;  %v465_v20 = vmul.f32 %v3564_v6, %v463_v16 }
 0x565   :  { %v448_v9 = vpop.permute.xlu0 %447 }
 0x566   :  { %v450_v10 = vmul.f32 %v3564_v6, %v448_v9 }
 0x568   :  { %452 = vrot.lane.b32.xlu1 %v450_v10, %s3709_s7 }
 0x5da   :  { %v453_v12 = vpop.permute.xlu1 %452 }
 0x5db   :  { %v455_v13 = vadd.f32 %v453_v12, %v3869_v45 }
 0x5dd   :  { %3565 = vtanh.f32 %v455_v13 }
 0x5e7   :  { %v3566_v14 = vpop.eup %3565 }
 0x5e8   :  { %459 = vrot.lane.b32.xlu0 %v3566_v14, %s3710_s3 }
 0x65a   :  { %v460_v17 = vpop.permute.xlu0 %459 }
 0x65b   :  { %v462_v18 = vmul.f32 %v460_v17, %v457_v15 }
 0x65d   :  { %v466_v23 = vadd.f32 %v465_v20, %v462_v18 }
 0x65f   :  { %v468_v25 = vrot.slane %v466_v23, 2  ;;  %v569_v48 = vrot.slane %v466_v23, 6  ;;  %v1099_v52 = vrot.slane %v466_v23, 1 }
 0x661   :  { %469 = vrot.lane.b32.xlu1 %v468_v25, %s3710_s3  ;;  %v1113_v58 = vsel %vm1112_vm5, %v3875_v60, %v1099_v52  ;;  %v1137_v59 = vsel %vm1112_vm5, %v1126_v54, %v468_v25 }
 0x6d3   :  { %v470_v26 = vpop.permute.xlu1 %469 }
 0x6d4   :  { %3144 = vmatmul.mubr.msk.f32.vlgmr.msra.gmra.mrb[4].mxu1 %vm177_vm4, %v470_v26 }
 0x6d5   :  { %3435 = vmatpush3.bf16.msra.mxu1 %v3824_v30  ;;  %3165 = vmatprep.mubr.msk.f32.mxu1 %vm3708_vm3, %v3706_v24 }
 0x6d6   :  { %3436 = vmatprep.subr.bf16.mxu1 %v3707_v31 }
 0x6d9   :  { %3438 = vmatpush3.bf16.msra.mxu1 %v3836_v34 }
 0x6da   :  { %3445 = vmatprep.subr.bf16.mxu1 %v3707_v31 }
 0x7a7   :  { %v539_v27 = vpop.f32.mrb[4].mxu1 }
 0x7a8   :  { %v540_v28 = vadd.f32 %v3865_v41, %v539_v27  ;;  %v3145_v29 = vpop.f32.mrb[5].mxu1 }
 0x7aa   :  { %v544_v32 = vrot.slane %v540_v28, 4 }
 0x7ac   :  { %553 = vrot.lane.b32.xlu0 %v544_v32, %s3709_s7  ;;  %v546_v33 = vadd.f32 %v544_v32, %v3869_v45 }
 0x7ae   :  { %v2875_v35 = vmul.f32 -1.442695, %v546_v33 }
 0x7b0   :  { %3567 = vpow2.f32 %v2875_v35 }
 0x7ba   :  { %v3568_v36 = vpop.eup %3567 }
 0x7bb   :  { %v550_v37 = vadd.f32 1.0, %v3568_v36 }
 0x7bd   :  { %3569 = vrcp.f32 %v550_v37 }
 0x7c7   :  { %v3570_v38 = vpop.eup %3569 }
 0x7c8   :  { %v563_v47 = vsub.f32 1.0, %v3570_v38  ;;  %v571_v50 = vmul.f32 %v3570_v38, %v569_v48 }
 0x81e   :  { %v554_v40 = vpop.permute.xlu0 %553 }
 0x81f   :  { %v556_v42 = vmul.f32 %v3570_v38, %v554_v40 }
 0x821   :  { %558 = vrot.lane.b32.xlu1 %v556_v42, %s3709_s7 }
 0x893   :  { %v559_v43 = vpop.permute.xlu1 %558 }
 0x894   :  { %v561_v44 = vadd.f32 %v559_v43, %v3869_v45 }
 0x896   :  { %3571 = vtanh.f32 %v561_v44 }
 0x8a0   :  { %v3572_v46 = vpop.eup %3571 }
 0x8a1   :  { %565 = vrot.lane.b32.xlu0 %v3572_v46, %s3710_s3 }
 0x913   :  { %v566_v49 = vpop.permute.xlu0 %565 }
 0x914   :  { %v568_v51 = vmul.f32 %v566_v49, %v563_v47 }
 0x916   :  { %v572_v53 = vadd.f32 %v571_v50, %v568_v51 }
 0x918   :  { %v1101_v55 = vrot.slane %v572_v53, 2  ;;  %v1129_v56 = vrot.slane %v572_v53, 3  ;;  %v574_v57 = vrot.slane %v572_v53, 4  ;;  %v675_v17 = vrot.slane %v572_v53, 6 }
 0x91a   :  { %575 = vrot.lane.b32.xlu1 %v574_v57, %s3710_s3  ;;  %v1138_v61 = vsel %vm1114_vm6, %v1137_v59, %v1129_v56  ;;  %v1115_v62 = vsel %vm1114_vm6, %v1113_v58, %v1101_v55  ;;  %vm2130_vm6 = vcmask 15360  }
 0x98c   :  { %v576_v63 = vpop.permute.xlu1 %575 }
 0x98d   :  { %3155 = vmatmul.mubr.msk.f32.vlgmr.msra.gmra.mrb[4].mxu0 %vm177_vm4, %v576_v63 }
 0x98e   :  { %3441 = vmatpush3.bf16.msra.mxu0 %v3824_v30  ;;  %3176 = vmatprep.mubr.msk.f32.mxu0 %vm3708_vm3, %v3706_v24 }
 0x98f   :  { %3442 = vmatprep.subr.bf16.mxu0 %v3707_v31 }
 0x992   :  { %3444 = vmatpush3.bf16.msra.mxu0 %v3836_v34 }
 0x993   :  { %3451 = vmatprep.subr.bf16.mxu0 %v3707_v31 }
 0xa60   :  { %v645_v60 = vpop.f32.mrb[4].mxu0 }
 0xa61   :  { %v646_v0 = vadd.f32 %v3865_v41, %v645_v60  ;;  %v3156_v1 = vpop.f32.mrb[5].mxu0 }
 0xa63   :  { %v650_v2 = vrot.slane %v646_v0, 2 }
 0xa65   :  { %659 = vrot.lane.b32.xlu0 %v650_v2, %s3709_s7  ;;  %v652_v3 = vadd.f32 %v650_v2, %v3869_v45 }
 0xa67   :  { %v2877_v4 = vmul.f32 -1.442695, %v652_v3 }
 0xa69   :  { %3573 = vpow2.f32 %v2877_v4 }
 0xa73   :  { %v3574_v5 = vpop.eup %3573 }
 0xa74   :  { %v656_v6 = vadd.f32 1.0, %v3574_v5 }
 0xa76   :  { %3575 = vrcp.f32 %v656_v6 }
 0xa80   :  { %v3576_v9 = vpop.eup %3575 }
 0xa81   :  { %v669_v16 = vsub.f32 1.0, %v3576_v9  ;;  %v677_v20 = vmul.f32 %v3576_v9, %v675_v17 }
 0xad7   :  { %v660_v10 = vpop.permute.xlu0 %659 }
 0xad8   :  { %v662_v12 = vmul.f32 %v3576_v9, %v660_v10 }
 0xada   :  { %664 = vrot.lane.b32.xlu1 %v662_v12, %s3709_s7 }
 0xb4c   :  { %v665_v13 = vpop.permute.xlu1 %664 }
 0xb4d   :  { %v667_v14 = vadd.f32 %v665_v13, %v3869_v45 }
 0xb4f   :  { %3577 = vtanh.f32 %v667_v14 }
 0xb59   :  { %v3578_v15 = vpop.eup %3577 }
 0xb5a   :  { %671 = vrot.lane.b32.xlu0 %v3578_v15, %s3710_s3 }
 0xbcc   :  { %v672_v18 = vpop.permute.xlu0 %671 }
 0xbcd   :  { %v674_v23 = vmul.f32 %v672_v18, %v669_v16 }
 0xbcf   :  { %v678_v25 = vadd.f32 %v677_v20, %v674_v23 }
 0xbd1   :  { %v1103_v26 = vrot.slane %v678_v25, 3  ;;  %v1131_v27 = vrot.slane %v678_v25, 4  ;;  %v680_v28 = vrot.slane %v678_v25, 6 }
 0xbd3   :  { %681 = vrot.lane.b32.xlu1 %v680_v28, %s3710_s3  ;;  %v1139_v29 = vsel %vm1116_vm7, %v1138_v61, %v1131_v27  ;;  %v1117_v45 = vsel %vm1116_vm7, %v1115_v62, %v1103_v26 }
 0xc45   :  { %v682_v32 = vpop.permute.xlu1 %681 }
 0xc46   :  { %3166 = vmatmul.mubr.msk.f32.vlgmr.msra.gmra.mrb[6].mxu1 %vm177_vm4, %v682_v32 }
 0xc47   :  { %3447 = vmatpush3.bf16.msra.mxu1 %v3824_v30  ;;  %3187 = vmatprep.mubr.msk.f32.mxu1 %vm3708_vm3, %v3706_v24 }
 0xc48   :  { %3448 = vmatprep.subr.bf16.mxu1 %v3707_v31 }
 0xc4b   :  { %3450 = vmatpush3.bf16.msra.mxu1 %v3836_v34 }
 0xd19   :  { %v751_v33 = vpop.f32.mrb[6].mxu1 }
 0xd1a   :  { %v752_v35 = vadd.f32 %v3865_v41, %v751_v33  ;;  %v3167_v36 = vpop.f32.mrb[7].mxu1 }
 0xd1c   :  { %763 = vrot.lane.b32.xlu0 %v752_v35, %s3709_s7  ;;  %v755_v37 = vadd.f32 %v752_v35, %v3860_v39 }
 0xd1e   :  { %v2879_v38 = vmul.f32 -1.442695, %v755_v37 }
 0xd20   :  { %3579 = vpow2.f32 %v2879_v38 }
 0xd2a   :  { %v3580_v40 = vpop.eup %3579 }
 0xd2b   :  { %v759_v42 = vadd.f32 1.0, %v3580_v40 }
 0xd2d   :  { %3581 = vrcp.f32 %v759_v42 }
 0xd37   :  { %v3582_v43 = vpop.eup %3581 }
 0xd38   :  { %v773_v50 = vsub.f32 1.0, %v3582_v43  ;;  %v780_v52 = vmul.f32 %v3582_v43, %v680_v28 }
 0xd8e   :  { %v764_v44 = vpop.permute.xlu0 %763 }
 0xd8f   :  { %v766_v46 = vmul.f32 %v3582_v43, %v764_v44 }
 0xd91   :  { %768 = vrot.lane.b32.xlu1 %v766_v46, %s3709_s7 }
 0xe03   :  { %v769_v47 = vpop.permute.xlu1 %768 }
 0xe04   :  { %v771_v48 = vadd.f32 %v769_v47, %v3860_v39 }
 0xe06   :  { %3583 = vtanh.f32 %v771_v48 }
 0xe10   :  { %v3584_v49 = vpop.eup %3583 }
 0xe11   :  { %775 = vrot.lane.b32.xlu0 %v3584_v49, %s3710_s3 }
 0xe83   :  { %v776_v51 = vpop.permute.xlu0 %775 }
 0xe84   :  { %v778_v53 = vmul.f32 %v776_v51, %v773_v50 }
 0xe86   :  { %v781_v54 = vadd.f32 %v780_v52, %v778_v53 }
 0xe88   :  { %v1105_v55 = vrot.slane %v781_v54, 4  ;;  %v1133_v56 = vrot.slane %v781_v54, 5  ;;  %783 = vrot.lane.b32.xlu1 %v781_v54, %s3710_s3  ;;  %v883_v12 = vrot.slane %v781_v54, 6 }
 0xe8a   :  { %v3942_v57 = vsel %vm1118_vm8, %v1139_v29, %v1133_v56  ;;  %v1119_v58 = vsel %vm1118_vm8, %v1117_v45, %v1105_v55 }
 0xefa   :  { %v784_v59 = vpop.permute.xlu1 %783 }
 0xefb   :  { %3177 = vmatmul.mubr.msk.f32.vlgmr.msra.gmra.mrb[6].mxu0 %vm177_vm4, %v784_v59 }
 0xefc   :  { %3453 = vmatpush3.bf16.msra.mxu0 %v3824_v30  ;;  %3198 = vmatprep.mubr.msk.f32.mxu0 %vm3708_vm3, %v3706_v24 }
 0xefd   :  { %3454 = vmatprep.subr.bf16.mxu0 %v3707_v31 }
 0xf00   :  { %3456 = vmatpush3.bf16.msra.mxu0 %v3836_v34 }
 0xf01   :  { %3457 = vmatprep.subr.bf16.mxu0 %v3707_v31 }
 0xfce   :  { %v853_v61 = vpop.f32.mrb[6].mxu0 }
 0xfcf   :  { %v854_v62 = vadd.f32 %v3865_v41, %v853_v61  ;;  %v3178_v63 = vpop.f32.mrb[7].mxu0 }
 0xfd1   :  { %v858_v60 = vrot.slane %v854_v62, 6 }
 0xfd3   :  { %867 = vrot.lane.b32.xlu0 %v858_v60, %s3709_s7  ;;  %v860_v0 = vadd.f32 %v858_v60, %v3860_v39 }
 0xfd5   :  { %v2881_v1 = vmul.f32 -1.442695, %v860_v0 }
 0xfd7   :  { %3585 = vpow2.f32 %v2881_v1 }
 0xfe1   :  { %v3586_v30 = vpop.eup %3585 }
 0xfe2   :  { %v864_v2 = vadd.f32 1.0, %v3586_v30 }
 0xfe4   :  { %3587 = vrcp.f32 %v864_v2 }
 0xfee   :  { %v3588_v3 = vpop.eup %3587 }
 0xfef   :  { %v877_v10 = vsub.f32 1.0, %v3588_v3  ;;  %v885_v15 = vmul.f32 %v3588_v3, %v883_v12 }
0x1045   :  { %v868_v4 = vpop.permute.xlu0 %867 }
0x1046   :  { %v870_v5 = vmul.f32 %v3588_v3, %v868_v4  ;;  %v1248_v3 = vld [vmem:[%s4611_s2] sm:$0xff]  ;;  %v1249_v4 = vld [vmem:[%s4611_s2 + $0x8] sm:$0x3f] }
0x1048   :  { %872 = vrot.lane.b32.xlu1 %v870_v5, %s3709_s7  ;;  %v1144_v5 = vld [vmem:[%s4612_s1] sm:$0xff] }
0x10ba   :  { %v873_v34 = vpop.permute.xlu1 %872 }
0x10bb   :  { %v875_v6 = vadd.f32 %v873_v34, %v3860_v39  ;;  %v3711_v34 = vmov 1  }
0x10bc   :  { %3552 = vset.pattern.permute.xlu0 %v3711_v34 }
0x10bd   :  { %3589 = vtanh.f32 %v875_v6  ;;  %v3712_v6 = vmov 2  }
0x10c7   :  { %v3590_v9 = vpop.eup %3589 }
0x10c8   :  { %879 = vrot.lane.b32.xlu0 %v3590_v9, %s3710_s3 }
0x113a   :  { %v880_v13 = vpop.permute.xlu0 %879 }
0x113b   :  { %v882_v14 = vmul.f32 %v880_v13, %v877_v10  ;;  %v44_v13 = vld [vmem:[%s4609_s4 + $0x70] sm:$0xff] }
0x113d   :  { %v886_v16 = vadd.f32 %v885_v15, %v882_v14  ;;  %v45_v14 = vld [vmem:[%s4609_s4 + $0x78] sm:$0xff] }
0x113e   :  { %v3466_v15 = vpack.c.bf16 %v45_v14, %v44_v13 }
0x113f   :  { %v1107_v17 = vrot.slane %v886_v16, 5  ;;  %v888_v18 = vrot.slane %v886_v16, 2  ;;  %v989_v44 = vrot.slane %v886_v16, 6 }
0x1141   :  { %889 = vrot.lane.b32.xlu1 %v888_v18, %s3710_s3  ;;  %v1121_v20 = vsel %vm1120_vm9, %v1119_v58, %v1107_v17  ;;  %v1141_v53 = vsel %vm1120_vm9, %v3942_v57, %v989_v44  ;;  %vm2133_vm9 = vcmask 23552  }
0x11b3   :  { %v890_v23 = vpop.permute.xlu1 %889 }
0x11b4   :  { %3188 = vmatmul.mubr.msk.f32.vlgmr.msra.gmra.mrb[8].mxu1 %vm177_vm4, %v890_v23 }
0x11b5   :  { %3210 = vmatprep.mubr.msk.f32.mxu1 %vm1254_vm11, %v1248_v3 }
0x1287   :  { %v959_v25 = vpop.f32.mrb[8].mxu1 }
0x1288   :  { %v960_v26 = vadd.f32 %v3865_v41, %v959_v25  ;;  %v3189_v27 = vpop.f32.mrb[9].mxu1 }
0x128a   :  { %v964_v28 = vrot.slane %v960_v26, 4  ;;  %v47_v26 = vld [vmem:[%s4609_s4 + $0x88] sm:$0xff] }
0x128c   :  { %973 = vrot.lane.b32.xlu0 %v964_v28, %s3709_s7  ;;  %v966_v29 = vadd.f32 %v964_v28, %v3860_v39 }
0x128e   :  { %v2883_v45 = vmul.f32 -1.442695, %v966_v29 }
0x1290   :  { %3591 = vpow2.f32 %v2883_v45 }
0x129a   :  { %v3592_v32 = vpop.eup %3591 }
0x129b   :  { %v970_v33 = vadd.f32 1.0, %v3592_v32 }
0x129d   :  { %3593 = vrcp.f32 %v970_v33 }
0x12a7   :  { %v3594_v35 = vpop.eup %3593 }
0x12a8   :  { %v983_v43 = vsub.f32 1.0, %v3594_v35  ;;  %v991_v47 = vmul.f32 %v3594_v35, %v989_v44 }
0x12fe   :  { %v974_v36 = vpop.permute.xlu0 %973 }
0x12ff   :  { %v976_v37 = vmul.f32 %v3594_v35, %v974_v36 }
0x1301   :  { %978 = vrot.lane.b32.xlu1 %v976_v37, %s3709_s7 }
0x1373   :  { %v979_v38 = vpop.permute.xlu1 %978 }
0x1374   :  { %v981_v40 = vadd.f32 %v979_v38, %v3860_v39 }
0x1376   :  { %3595 = vtanh.f32 %v981_v40 }
0x1380   :  { %v3596_v42 = vpop.eup %3595 }
0x1381   :  { %985 = vrot.lane.b32.xlu0 %v3596_v42, %s3710_s3 }
0x13f3   :  { %v986_v46 = vpop.permute.xlu0 %985 }
0x13f4   :  { %v988_v48 = vmul.f32 %v986_v46, %v983_v43 }
0x13f6   :  { %v3967_v49 = vadd.f32 %v991_v47, %v988_v48 }
0x13f8   :  { %v1135_v50 = vrot.slane %v3967_v49, 7  ;;  %v994_v51 = vrot.slane %v3967_v49, 4  ;;  %v1095_v52 = vrot.slane %v3967_v49, 6 }
0x13fa   :  { %995 = vrot.lane.b32.xlu1 %v994_v51, %s3710_s3  ;;  %v3976_v54 = vsel %vm4614_vm10, %v1141_v53, %v1135_v50  ;;  %v3979_v55 = vsel %vm4614_vm10, %v1121_v20, %v1095_v52  ;;  %v46_v20 = vld [vmem:[%s4609_s4 + $0x80] sm:$0xff]  ;;  %v41_v53 = vld [vmem:[%s4609_s4 + $0x58] sm:$0xff]  ;;  %vm2301_vm10 = vcmask 52224  }
0x13fb   :  { %v3470_v28 = vpack.c.bf16 %v47_v26, %v46_v20 }
0x146c   :  { %v996_v56 = vpop.permute.xlu1 %995 }
0x146d   :  { %3199 = vmatmul.mubr.msk.f32.vlgmr.msra.gmra.mrb[8].mxu0 %vm177_vm4, %v996_v56  ;;  %v42_v56 = vld [vmem:[%s4609_s4 + $0x60] sm:$0xff] }
0x146e   :  { %3205 = vmatprep.mubr.msk.f32.mxu0 %vm3708_vm3, %v3706_v24 }
0x1540   :  { %v1065_v58 = vpop.f32.mrb[8].mxu0 }
0x1541   :  { %v1066_v59 = vadd.f32 %v3865_v41, %v1065_v58  ;;  %v3200_v61 = vpop.f32.mrb[9].mxu0  ;;  %v38_v41 = vld [vmem:[%s4609_s4 + $0x40] sm:$0xf]  ;;  %v43_v58 = vld [vmem:[%s4609_s4 + $0x68] sm:$0xff] }
0x1542   :  { %3208 = vmatprep.subr.msk.mxu1 %vm1118_vm8, %v38_v41  ;;  %v4080_v61 = vshrl.u32 %v77_v21, 7  ;;  %v51_v21 = vld [vmem:[%s4609_s4 + $0xa8] sm:$0xff] }
0x1543   :  { %v1070_v62 = vrot.slane %v1066_v59, 2  ;;  %3209 = vmatpush3.msk.msra.mxu1 %vm1118_vm8, %v38_v41  ;;  %v3464_v59 = vpack.c.bf16 %v43_v58, %v42_v56 }
0x1544   :  { %3211 = vmatmul.mubr.msk.f32.vlgmr.msra.gmra.mrb[10].mxu1 %vm1254_vm11, %v1249_v4  ;;  %3467 = vmatprep.subr.bf16.mxu1 %v3466_v15  ;;  %v1536_v34 = vsub.s32 2, %v4080_v61 }
0x1545   :  { %1079 = vrot.lane.b32.xlu0 %v1070_v62, %s3709_s7  ;;  %v1072_v57 = vadd.f32 %v1070_v62, %v3860_v39  ;;  %3469 = vmatpush3.bf16.msra.mxu1 %v3466_v15  ;;  %v1524_v62 = vsub.s32 0, %v4080_v61 }
0x1546   :  { %3471 = vmatprep.subr.bf16.mxu1 %v3470_v28 }
0x1547   :  { %v2885_v63 = vmul.f32 -1.442695, %v1072_v57 }
0x1549   :  { %3597 = vpow2.f32 %v2885_v63  ;;  %3473 = vmatpush3.bf16.msra.mxu1 %v3470_v28 }
0x154a   :  { %3474 = vmatprep.subr.bf16.mxu1 %v3707_v31 }
0x1553   :  { %v3598_v60 = vpop.eup %3597 }
0x1554   :  { %v1076_v0 = vadd.f32 1.0, %v3598_v60 }
0x1556   :  { %3599 = vrcp.f32 %v1076_v0  ;;  %v49_v0 = vld [vmem:[%s4609_s4 + $0x98] sm:$0xff] }
0x1560   :  { %v3600_v1 = vpop.eup %3599 }
0x1561   :  { %v1089_v23 = vsub.f32 1.0, %v3600_v1  ;;  %v1097_v29 = vmul.f32 %v3600_v1, %v1095_v52  ;;  %v40_v52 = vld [vmem:[%s4609_s4 + $0x50] sm:$0xff] }
0x15b7   :  { %v1080_v30 = vpop.permute.xlu0 %1079 }
0x15b8   :  { %v1082_v2 = vmul.f32 %v3600_v1, %v1080_v30  ;;  %v50_v1 = vld [vmem:[%s4609_s4 + $0xa0] sm:$0xff] }
0x15b9   :  { %v3475_v30 = vpack.c.bf16 %v50_v1, %v49_v0 }
0x15ba   :  { %1084 = vrot.lane.b32.xlu1 %v1082_v2, %s3709_s7  ;;  %v52_v2 = vld [vmem:[%s4609_s4 + $0xb0] sm:$0xff] }
0x15bb   :  { %v3478_v41 = vpack.c.bf16 %v52_v2, %v51_v21 }
0x15be   :  { %1146 = vperm.xlu1 %3551, %v1144_v5  }
0x15c2   :  { %3553 = vset.pattern.permute.xlu1 %v3712_v6 }
0x15c3   :  { %1159 = vperm.xlu1 %3553, %v1144_v5  }
0x1617   :  { %v3212_v16 = vpop.f32.mrb[10].mxu1 }
0x1618   :  { %v1330_v18 = vpop.f32.mrb[11].mxu1 }
0x162c   :  { %v1085_v9 = vpop.permute.xlu1 %1084 }
0x162d   :  { %v1087_v10 = vadd.f32 %v1085_v9, %v3860_v39  ;;  %v2890_v39 = vld [vmem:[%s4609_s4 + $0x48] ss:$0 sm:$0xff]  ;;  %v1548_v9 = vsub.s32 4, %v4080_v61 }
0x162e   :  { %v4015_v17 = vadd.f32 %v3212_v16, %v2890_v39  ;;  %v1331_v25 = vadd.f32 %v2890_v39, %v1330_v18 }
0x162f   :  { %3601 = vtanh.f32 %v1087_v10  ;;  %v1554_v10 = vsub.s32 5, %v4080_v61 }
0x1630   :  { %v4023_v32 = vmax.f32 %v1331_v25, 0.0  ;;  %v1340_v33 = vmax.f32 %v4015_v17, 0.0 }
0x1632   :  { %3238 = vmatprep.mubr.msk.f32.mxu1 %vm177_vm4, %v4023_v32 }
0x1633   :  { %3239 = vmatmul.mubr.msk.f32.vlgmr.msra.gmra.mrb[12].mxu1 %vm177_vm4, %v1340_v33 }
0x1634   :  { %3249 = vmatprep.mubr.msk.f32.mxu1 %vm3708_vm3, %v3706_v24  ;;  %3476 = vmatpush3.bf16.msra.mxu1 %v3475_v30 }
0x1635   :  { %3477 = vmatprep.subr.bf16.mxu1 %v3707_v31 }
0x1638   :  { %3479 = vmatpush3.bf16.msra.mxu1 %v3478_v41 }
0x1639   :  { %v3602_v12 = vpop.eup %3601 }
0x163a   :  { %1091 = vrot.lane.b32.xlu0 %v3602_v12, %s3710_s3  ;;  %v1560_v12 = vsub.s32 6, %v4080_v61 }
0x163d   :  { %v1147_v40 = vpop.permute.xlu1 %1146 }
0x163e   :  { %1152 = vperm.xlu0 %3552, %v1144_v5   ;;  %vm1148_vm13 = vcmp.eq.s32.totalorder %v3810_v22, %v1147_v40  ;;  %v1530_v5 = vsub.s32 1, %v4080_v61 }
0x163f   :  { %v2886_v44 = vsel %vm1148_vm13, 1.0, %v3706_v24  ;;  %vm2138_vm13 = vcmask 39936  }
0x1642   :  { %3554 = vset.pattern.permute.xlu0 %v3712_v6  ;;  %v1160_v43 = vpop.permute.xlu1 %1159  ;;  %v1542_v6 = vsub.s32 3, %v4080_v61 }
0x1643   :  { %vm1161_vm15 = vcmp.eq.s32.totalorder %v3810_v22, %v1160_v43 }
0x1644   :  { %v2888_v48 = vsel %vm1161_vm15, 1.0, %v3706_v24  ;;  %vm2144_vm15 = vcmask 56320  }
0x16ac   :  { %v1092_v27 = vpop.permute.xlu0 %1091 }
0x16ad   :  { %v1094_v45 = vmul.f32 %v1092_v27, %v1089_v23  ;;  %v4119_v23 = vld [vmem:[%s4609_s4 + $0x90] ss:$0 sm:$0xff] }
0x16af   :  { %v1098_v35 = vadd.f32 %v1097_v29, %v1094_v45 }
0x16b1   :  { %v1110_v36 = vrot.slane %v1098_v35, 7  ;;  %v4031_v37 = vsel %vm1124_vm12, %v3976_v54, %v1098_v35 }
0x16b2   :  { %1170 = vrot.lane.b32.xlu0 %v4031_v37, %s3710_s3  ;;  %v1345_v43 = vrot.slane %v4031_v37, 4 }
0x16b3   :  { %v1125_v38 = vsel %vm1124_vm12, %v3979_v55, %v1110_v36 }
0x16b4   :  { %1168 = vrot.lane.b32.xlu1 %v1125_v38, %s3710_s3 }
0x16bd   :  { %v1153_v42 = vpop.permute.xlu0 %1152 }
0x16be   :  { %vm1154_vm14 = vcmp.eq.s32.totalorder %v3810_v22, %v1153_v42  ;;  %v3461_v22 = vpack.c.bf16 %v41_v53, %v40_v52  ;;  %v1566_v53 = vsub.s32 7, %v4080_v61 }
0x16bf   :  { %v2887_v46 = vsel %vm1154_vm14, 1.0, %v3706_v24  ;;  %vm2141_vm14 = vcmask 48128  }
0x16c0   :  { %v1157_v47 = vadd.f32 %v2887_v46, %v2886_v44 }
0x16c2   :  { %v1164_v49 = vadd.f32 %v2888_v48, %v1157_v47 }
0x16c4   :  { %v1165_v55 = vmul.f32 0.33333334, %v1164_v49 }
0x1706   :  { %v4083_v57 = vpop.f32.mrb[12].mxu1 }
0x1707   :  { %v4086_v63 = vrot.slane %v4083_v57, %v1524_v62  ;;  %v1513_v60 = vpop.f32.mrb[13].mxu1  ;;  %v1591_v56 = vrot.slane %v4083_v57, %v1542_v6  ;;  %v1597_v58 = vrot.slane %v4083_v57, %v1548_v9 }
0x1708   :  { %v1525_v13 = vrot.slane %v1513_v60, %v1524_v62  ;;  %v1531_v14 = vrot.slane %v1513_v60, %v1530_v5  ;;  %v1537_v15 = vrot.slane %v1513_v60, %v1536_v34  ;;  %v4110_v16 = vrot.slane %v1513_v60, %v1542_v6 }
0x1709   :  { %v4112_v39 = vrot.slane %v1513_v60, %v1548_v9  ;;  %v4114_v18 = vrot.slane %v1513_v60, %v1554_v10  ;;  %v1561_v20 = vrot.slane %v1513_v60, %v1560_v12 }
0x1724   :  { %v4049_v50 = vpop.permute.xlu0 %1170 }
0x1726   :  { %v4051_v51 = vpop.permute.xlu1 %1168 }
0x1727   :  { %v3458_v54 = vpack.c.bf16 %v4049_v50, %v4051_v51 }
0x1729   :  { %3459 = vmatpush3.bf16.msra.mxu0 %v3458_v54  ;;  %v1579_v54 = vrot.slane %v4083_v57, %v1530_v5 }
0x172a   :  { %3460 = vmatprep.subr.bf16.mxu0 %v3707_v31 }
0x172c   :  { %3206 = vmatmul.mubr.msk.f32.vlgmr.msra.gmra.mrb[10].mxu0 %vm1174_vm1, %v1165_v55  ;;  %v1585_v55 = vrot.slane %v4083_v57, %v1536_v34  ;;  %vm2297_vm1 = vcmask 56324  }
0x172d   :  { %3462 = vmatpush3.bf16.msra.mxu0 %v3461_v22  ;;  %3221 = vmatprep.mubr.msk.f32.mxu0 %vm3708_vm3, %v3706_v24  ;;  %v1567_v22 = vrot.slane %v1513_v60, %v1566_v53 }
0x172e   :  { %3463 = vmatprep.subr.bf16.mxu0 %v3707_v31 }
0x1731   :  { %3465 = vmatpush3.bf16.msra.mxu0 %v3464_v59  ;;  %v1603_v59 = vrot.slane %v4083_v57, %v1554_v10 }
0x1732   :  { %3312 = vmatprep.subr.mxu0 %v3706_v24 }
0x1734   :  { %3222 = vmatmul.mubr.msk.f32.vlgmr.msra.gmra.mrb[12].mxu0 %vm177_vm4, %v4051_v51 }
0x1735   :  { %3313 = vmatpush3.msk.msra.mxu0 %vm1124_vm12, %v4023_v32  ;;  %3224 = vmatprep.mubr.msk.f32.mxu0 %vm3708_vm3, %v3706_v24 }
0x1736   :  { %3317 = vmatprep.subr.mxu0 %v3706_v24 }
0x17ff   :  { %v4101_v3 = vpop.f32.mrb[10].mxu0 }
0x1800   :  { %1342 = vrot.lane.b32.xlu1 %v4101_v3, %s3713_s13  ;;  %v3207_v4 = vpop.f32.mrb[11].mxu0 }
0x1807   :  { %v1427_v25 = vpop.f32.mrb[12].mxu0 }
0x1808   :  { %v1526_v26 = vadd.f32 %v1525_v13, %v1427_v25  ;;  %v4121_v27 = vadd.f32 %v1531_v14, %v1427_v25  ;;  %v4123_v28 = vadd.f32 %v1537_v15, %v1427_v25  ;;  %v4126_v29 = vadd.f32 %v4110_v16, %v1427_v25  ;;  %v3223_v45 = vpop.f32.mrb[13].mxu0 }
0x1809   :  { %v4129_v35 = vadd.f32 %v4112_v39, %v1427_v25  ;;  %v4132_v36 = vadd.f32 %v4114_v18, %v1427_v25  ;;  %v4134_v38 = vadd.f32 %v1561_v20, %v1427_v25 }
0x180a   :  { %v1659_v40 = vadd.f32 %v4119_v23, %v1526_v26  ;;  %v1608_v45 = vrot.slane %v4121_v27, 4  ;;  %v1615_v53 = vrot.slane %v4126_v29, 4 }
0x180c   :  { %3603 = vtanh.f32 %v1659_v40 }
0x1816   :  { %v3604_v42 = vpop.eup %3603 }
0x1817   :  { %3250 = vmatmul.mubr.msk.f32.vlgmr.msra.gmra.mrb[14].mxu1 %vm177_vm4, %v3604_v42 }
0x1818   :  { %3252 = vmatprep.mubr.msk.f32.mxu1 %vm3708_vm3, %v3706_v24 }
0x1872   :  { %v1343_v44 = vpop.permute.xlu1 %1342 }
0x1873   :  { %v1348_v46 = vsel %vm1118_vm8, %v1345_v43, %v1343_v44  ;;  %v1347_v47 = vsel %vm1118_vm8, %v1343_v44, %v1345_v43 }
0x1874   :  { %1353 = vrot.lane.b32.xlu1 %v1348_v46, %s3710_s3  ;;  %1351 = vrot.lane.b32.xlu0 %v1347_v47, %s3710_s3 }
0x18e6   :  { %v1352_v48 = vpop.permute.xlu0 %1351  ;;  %v1354_v49 = vpop.permute.xlu1 %1353 }
0x18e7   :  { %3225 = vmatmul.mubr.msk.f32.gmra.mrb[14].mxu0 %vm177_vm4, %v1352_v48 }
0x18e8   :  { %3227 = vmatprep.mubr.msk.f32.mxu0 %vm3708_vm3, %v3706_v24 }
0x18ea   :  { %v4148_v52 = vpop.f32.mrb[14].mxu1 }
0x18eb   :  { %3228 = vmatmul.mubr.msk.f32.gmra.mrb[16].mxu0 %vm177_vm4, %v1354_v49  ;;  %v3251_v37 = vpop.f32.mrb[15].mxu1 }
0x18ec   :  { %3314 = vmatprep.mubr.msk.f32.mxu0 %vm3708_vm3, %v3706_v24 }
0x19ba   :  { %v1432_v62 = vpop.f32.mrb[14].mxu0 }
0x19bb   :  { %v3226_v0 = vpop.f32.mrb[15].mxu0  ;;  %v1563_v1 = vadd.f32 %v1561_v20, %v1432_v62  ;;  %v1568_v21 = vadd.f32 %v1567_v22, %v1432_v62  ;;  %v1574_v30 = vadd.f32 %v4086_v63, %v1432_v62  ;;  %v1580_v2 = vadd.f32 %v1579_v54, %v1432_v62 }
0x19bc   :  { %v1586_v41 = vadd.f32 %v1585_v55, %v1432_v62  ;;  %v1592_v61 = vadd.f32 %v1591_v56, %v1432_v62  ;;  %v1598_v4 = vadd.f32 %v1597_v58, %v1432_v62  ;;  %v1604_v5 = vadd.f32 %v1603_v59, %v1432_v62 }
0x19bd   :  { %v4161_v60 = vsel %vm1118_vm8, %v1563_v1, %v1568_v21  ;;  %v1533_v34 = vadd.f32 %v1531_v14, %v1432_v62  ;;  %v1527_v12 = vadd.f32 %v1525_v13, %v1432_v62  ;;  %v1539_v9 = vadd.f32 %v1537_v15, %v1432_v62 }
0x19be   :  { %v1437_v6 = vpop.f32.mrb[16].mxu0  ;;  %v1629_v44 = vrot.slane %v1574_v30, 4  ;;  %v1636_v46 = vrot.slane %v1586_v41, 4  ;;  %v1643_v15 = vrot.slane %v1598_v4, 4  ;;  %v1551_v0 = vadd.f32 %v4112_v39, %v1432_v62 }
0x19bf   :  { %v4163_v25 = vadd.f32 %v1567_v22, %v1437_v6  ;;  %v1575_v57 = vadd.f32 %v4086_v63, %v1437_v6  ;;  %v4166_v10 = vadd.f32 %v1579_v54, %v1437_v6  ;;  %v1587_v20 = vadd.f32 %v1585_v55, %v1437_v6  ;;  %v3229_v26 = vpop.f32.mrb[17].mxu0 }
0x19c0   :  { %v4169_v40 = vadd.f32 %v1591_v56, %v1437_v6  ;;  %v1599_v42 = vadd.f32 %v1597_v58, %v1437_v6  ;;  %v4171_v43 = vadd.f32 %v1603_v59, %v1437_v6  ;;  %v1648_v48 = vsel %vm1118_vm8, %v1527_v12, %v1608_v45 }
0x19c1   :  { %v1630_v14 = vrot.slane %v1575_v57, 4  ;;  %v1637_v13 = vrot.slane %v1587_v20, 4  ;;  %v1609_v55 = vrot.slane %v1533_v34, 4  ;;  %v1649_v56 = vsel %vm1118_vm8, %v1539_v9, %v1615_v53 }
0x19c2   :  { %v1644_v47 = vrot.slane %v1599_v42, 4  ;;  %v1622_v58 = vrot.slane %v4132_v36, 4  ;;  %v1545_v59 = vadd.f32 %v4110_v16, %v1432_v62  ;;  %v1557_v21 = vadd.f32 %v4114_v18, %v1432_v62 }
0x19c3   :  { %v4175_v63 = vsel %vm1118_vm8, %v1629_v44, %v1630_v14  ;;  %v4178_v49 = vsel %vm1118_vm8, %v1636_v46, %v1637_v13  ;;  %v4181_v27 = vsel %vm1118_vm8, %v1630_v14, %v1580_v2  ;;  %v4184_v37 = vsel %vm1118_vm8, %v1637_v13, %v1592_v61 }
0x19c4   :  { %v4188_v54 = vsel %vm1118_vm8, %v1643_v15, %v1644_v47  ;;  %v4191_v22 = vsel %vm1118_vm8, %v1644_v47, %v1604_v5  ;;  %v1610_v1 = vsel %vm1118_vm8, %v1608_v45, %v1609_v55  ;;  %v1616_v29 = vrot.slane %v1545_v59, 4 }
0x19c5   :  { %v1650_v30 = vsel %vm1118_vm8, %v1551_v0, %v1622_v58  ;;  %v1623_v2 = vrot.slane %v1557_v21, 4  ;;  %v1660_v61 = vadd.f32 %v4119_v23, %v1648_v48  ;;  %v1661_v36 = vadd.f32 %v4119_v23, %v1610_v1 }
0x19c6   :  { %v1617_v41 = vsel %vm1118_vm8, %v1615_v53, %v1616_v29  ;;  %v1662_v16 = vadd.f32 %v4119_v23, %v4123_v28  ;;  %v1663_v39 = vadd.f32 %v4119_v23, %v1649_v56  ;;  %v1665_v34 = vadd.f32 %v4119_v23, %v4129_v35 }
0x19c7   :  { %v1624_v4 = vsel %vm1118_vm8, %v1622_v58, %v1623_v2  ;;  %3605 = vtanh.f32 %v1660_v61  ;;  %v1664_v62 = vadd.f32 %v4119_v23, %v1617_v41  ;;  %v1666_v6 = vadd.f32 %v4119_v23, %v1650_v30 }
0x19c8   :  { %3607 = vtanh.f32 %v1661_v36  ;;  %v1667_v35 = vadd.f32 %v4119_v23, %v1624_v4  ;;  %v1668_v57 = vadd.f32 %v4119_v23, %v4134_v38  ;;  %v1669_v26 = vadd.f32 %v4119_v23, %v4161_v60 }
0x19c9   :  { %3609 = vtanh.f32 %v1662_v16  ;;  %v1670_v38 = vadd.f32 %v4119_v23, %v4163_v25  ;;  %v1671_v44 = vadd.f32 %v4119_v23, %v4175_v63  ;;  %v1672_v25 = vadd.f32 %v4119_v23, %v4181_v27 }
0x19ca   :  { %3611 = vtanh.f32 %v1663_v39  ;;  %v1673_v46 = vadd.f32 %v4119_v23, %v4166_v10  ;;  %v1674_v15 = vadd.f32 %v4119_v23, %v4178_v49  ;;  %v1675_v10 = vadd.f32 %v4119_v23, %v4184_v37  ;;  %v4306_v39 = vld [vmem:[%s4609_s4 + $0xc0] ss:$0 sm:$0xff] }
0x19cb   :  { %3613 = vtanh.f32 %v1664_v62  ;;  %v1676_v63 = vadd.f32 %v4119_v23, %v4169_v40  ;;  %v1677_v27 = vadd.f32 %v4119_v23, %v4188_v54  ;;  %v1678_v40 = vadd.f32 %v4119_v23, %v4191_v22 }
0x19cc   :  { %3615 = vtanh.f32 %v1665_v34  ;;  %v1679_v54 = vadd.f32 %v4119_v23, %v4171_v43  ;;  %v4297_v43 = vld [vmem:[%s4609_s4 + $0xb8] ss:$0 sm:$0xff] }
0x19cd   :  { %3617 = vtanh.f32 %v1666_v6 }
0x19ce   :  { %3619 = vtanh.f32 %v1667_v35 }
0x19cf   :  { %3621 = vtanh.f32 %v1668_v57 }
0x19d0   :  { %3623 = vtanh.f32 %v1669_v26 }
0x19d1   :  { %v3606_v18 = vpop.eup %3605  ;;  %3625 = vtanh.f32 %v1670_v38 }
0x19d2   :  { %3253 = vmatmul.mubr.msk.f32.gmra.mrb[16].mxu1 %vm177_vm4, %v3606_v18  ;;  %v3608_v5 = vpop.eup %3607  ;;  %3627 = vtanh.f32 %v1671_v44 }
0x19d3   :  { %3255 = vmatprep.mubr.msk.f32.mxu1 %vm3708_vm3, %v3706_v24  ;;  %v3610_v28 = vpop.eup %3609  ;;  %3629 = vtanh.f32 %v1672_v25 }
0x19d4   :  { %v3612_v12 = vpop.eup %3611  ;;  %3631 = vtanh.f32 %v1673_v46 }
0x19d5   :  { %v3614_v9 = vpop.eup %3613  ;;  %3633 = vtanh.f32 %v1674_v15 }
0x19d6   :  { %3256 = vmatmul.mubr.msk.f32.gmra.mrb[18].mxu1 %vm177_vm4, %v3608_v5  ;;  %v3616_v20 = vpop.eup %3615  ;;  %3635 = vtanh.f32 %v1675_v10 }
0x19d7   :  { %3258 = vmatprep.mubr.msk.f32.mxu1 %vm3708_vm3, %v3706_v24  ;;  %v3618_v45 = vpop.eup %3617  ;;  %3637 = vtanh.f32 %v1676_v63 }
0x19d8   :  { %v3620_v42 = vpop.eup %3619  ;;  %3639 = vtanh.f32 %v1677_v27 }
0x19d9   :  { %v3622_v60 = vpop.eup %3621  ;;  %3641 = vtanh.f32 %v1678_v40 }
0x19da   :  { %3259 = vmatmul.mubr.msk.f32.gmra.mrb[20].mxu1 %vm177_vm4, %v3610_v28  ;;  %v3624_v14 = vpop.eup %3623  ;;  %3643 = vtanh.f32 %v1679_v54 }
0x19db   :  { %3261 = vmatprep.mubr.msk.f32.mxu1 %vm3708_vm3, %v3706_v24  ;;  %v3626_v13 = vpop.eup %3625 }
0x19dc   :  { %v3628_v47 = vpop.eup %3627 }
0x19dd   :  { %v3630_v48 = vpop.eup %3629 }
0x19de   :  { %3262 = vmatmul.mubr.msk.f32.gmra.mrb[22].mxu1 %vm177_vm4, %v3612_v12  ;;  %v3632_v49 = vpop.eup %3631 }
0x19df   :  { %3264 = vmatprep.mubr.msk.f32.mxu1 %vm3708_vm3, %v3706_v24  ;;  %v3634_v37 = vpop.eup %3633 }
0x19e0   :  { %v3636_v53 = vpop.eup %3635 }
0x19e1   :  { %v3638_v55 = vpop.eup %3637 }
0x19e2   :  { %3265 = vmatmul.mubr.msk.f32.gmra.mrb[24].mxu1 %vm177_vm4, %v3614_v9  ;;  %v3640_v22 = vpop.eup %3639 }
0x19e3   :  { %3267 = vmatprep.mubr.msk.f32.mxu1 %vm3708_vm3, %v3706_v24  ;;  %v3642_v56 = vpop.eup %3641 }
0x19e4   :  { %v3644_v23 = vpop.eup %3643 }
0x19e6   :  { %3268 = vmatmul.mubr.msk.f32.gmra.mrb[26].mxu1 %vm177_vm4, %v3616_v20 }
0x19e7   :  { %3270 = vmatprep.mubr.msk.f32.mxu1 %vm3708_vm3, %v3706_v24 }
0x19ea   :  { %3271 = vmatmul.mubr.msk.f32.gmra.mrb[28].mxu1 %vm177_vm4, %v3618_v45 }
0x19eb   :  { %3273 = vmatprep.mubr.msk.f32.mxu1 %vm3708_vm3, %v3706_v24 }
0x19ee   :  { %3274 = vmatmul.mubr.msk.f32.gmra.mrb[30].mxu1 %vm177_vm4, %v3620_v42 }
0x19ef   :  { %3276 = vmatprep.mubr.msk.f32.mxu1 %vm3708_vm3, %v3706_v24 }
0x19f2   :  { %3277 = vmatmul.mubr.msk.f32.gmra.mrb[32].mxu1 %vm177_vm4, %v3622_v60 }
0x19f3   :  { %3279 = vmatprep.mubr.msk.f32.mxu1 %vm3708_vm3, %v3706_v24 }
0x19f6   :  { %3280 = vmatmul.mubr.msk.f32.gmra.mrb[34].mxu1 %vm177_vm4, %v3624_v14 }
0x19f7   :  { %3282 = vmatprep.mubr.msk.f32.mxu1 %vm3708_vm3, %v3706_v24 }
0x19fa   :  { %3283 = vmatmul.mubr.msk.f32.gmra.mrb[36].mxu1 %vm177_vm4, %v3626_v13 }
0x19fb   :  { %3285 = vmatprep.mubr.msk.f32.mxu1 %vm3708_vm3, %v3706_v24 }
0x19fe   :  { %3286 = vmatmul.mubr.msk.f32.gmra.mrb[38].mxu1 %vm177_vm4, %v3628_v47 }
0x19ff   :  { %3288 = vmatprep.mubr.msk.f32.mxu1 %vm3708_vm3, %v3706_v24 }
0x1a02   :  { %3289 = vmatmul.mubr.msk.f32.gmra.mrb[40].mxu1 %vm177_vm4, %v3630_v48 }
0x1a03   :  { %3291 = vmatprep.mubr.msk.f32.mxu1 %vm3708_vm3, %v3706_v24 }
0x1a06   :  { %3292 = vmatmul.mubr.msk.f32.gmra.mrb[42].mxu1 %vm177_vm4, %v3632_v49 }
0x1a07   :  { %3294 = vmatprep.mubr.msk.f32.mxu1 %vm3708_vm3, %v3706_v24 }
0x1a0a   :  { %3295 = vmatmul.mubr.msk.f32.gmra.mrb[44].mxu1 %vm177_vm4, %v3634_v37 }
0x1a0b   :  { %3297 = vmatprep.mubr.msk.f32.mxu1 %vm3708_vm3, %v3706_v24 }
0x1a0e   :  { %3298 = vmatmul.mubr.msk.f32.gmra.mrb[46].mxu1 %vm177_vm4, %v3636_v53 }
0x1a0f   :  { %3300 = vmatprep.mubr.msk.f32.mxu1 %vm3708_vm3, %v3706_v24 }
0x1a12   :  { %3301 = vmatmul.mubr.msk.f32.gmra.mrb[48].mxu1 %vm177_vm4, %v3638_v55 }
0x1a13   :  { %3303 = vmatprep.mubr.msk.f32.mxu1 %vm3708_vm3, %v3706_v24 }
0x1a16   :  { %3304 = vmatmul.mubr.msk.f32.gmra.mrb[50].mxu1 %vm177_vm4, %v3640_v22 }
0x1a17   :  { %3306 = vmatprep.mubr.msk.f32.mxu1 %vm3708_vm3, %v3706_v24 }
0x1a1a   :  { %3307 = vmatmul.mubr.msk.f32.gmra.mrb[52].mxu1 %vm177_vm4, %v3642_v56 }
0x1a1b   :  { %3309 = vmatprep.mubr.msk.f32.mxu1 %vm3708_vm3, %v3706_v24 }
0x1a1e   :  { %3310 = vmatmul.mubr.msk.f32.gmra.mrb[54].mxu1 %vm177_vm4, %v3644_v23 }
0x1aa5   :  { %v1839_v58 = vpop.f32.mrb[16].mxu1 }
0x1aa6   :  { %v1840_v59 = vadd.f32 %v4297_v43, %v1839_v58  ;;  %v3254_v0 = vpop.f32.mrb[17].mxu1 }
0x1aa8   :  { %3645 = vtanh.f32 %v1840_v59 }
0x1aa9   :  { %v1844_v1 = vpop.f32.mrb[18].mxu1 }
0x1aaa   :  { %v1845_v21 = vadd.f32 %v4297_v43, %v1844_v1  ;;  %v3257_v29 = vpop.f32.mrb[19].mxu1 }
0x1aac   :  { %3647 = vtanh.f32 %v1845_v21 }
0x1aad   :  { %v1849_v30 = vpop.f32.mrb[20].mxu1 }
0x1aae   :  { %v1850_v2 = vadd.f32 %v4297_v43, %v1849_v30  ;;  %v3260_v41 = vpop.f32.mrb[21].mxu1 }
0x1ab0   :  { %3649 = vtanh.f32 %v1850_v2 }
0x1ab1   :  { %v1854_v61 = vpop.f32.mrb[22].mxu1 }
0x1ab2   :  { %v3646_v4 = vpop.eup %3645  ;;  %v1855_v36 = vadd.f32 %v4297_v43, %v1854_v61  ;;  %v3263_v16 = vpop.f32.mrb[23].mxu1 }
0x1ab3   :  { %v1964_v18 = vmul.f32 %v3646_v4, %v4306_v39 }
0x1ab4   :  { %3651 = vtanh.f32 %v1855_v36 }
0x1ab5   :  { %v1859_v62 = vpop.f32.mrb[24].mxu1  ;;  %v1987_v5 = vsel %vm177_vm4, %v1964_v18, 0.0 }
0x1ab6   :  { %v3648_v34 = vpop.eup %3647  ;;  %v1860_v28 = vadd.f32 %v4297_v43, %v1859_v62  ;;  %1988 = vadd.xlane.f32.xlu0 %v1987_v5  ;;  %v3266_v6 = vpop.f32.mrb[25].mxu1 }
0x1ab7   :  { %v1965_v12 = vmul.f32 %v3648_v34, %v4306_v39 }
0x1ab8   :  { %3653 = vtanh.f32 %v1860_v28 }
0x1ab9   :  { %v1864_v35 = vpop.f32.mrb[26].mxu1  ;;  %v1990_v9 = vsel %vm177_vm4, %v1965_v12, 0.0 }
0x1aba   :  { %v3650_v57 = vpop.eup %3649  ;;  %v1865_v20 = vadd.f32 %v4297_v43, %v1864_v35  ;;  %1991 = vadd.xlane.f32.xlu1 %v1990_v9  ;;  %v3269_v26 = vpop.f32.mrb[27].mxu1 }
0x1abb   :  { %v1966_v45 = vmul.f32 %v3650_v57, %v4306_v39 }
0x1abc   :  { %3655 = vtanh.f32 %v1865_v20 }
0x1abd   :  { %v1869_v38 = vpop.f32.mrb[28].mxu1  ;;  %v1993_v42 = vsel %vm177_vm4, %v1966_v45, 0.0 }
0x1abe   :  { %v3652_v44 = vpop.eup %3651  ;;  %v1870_v60 = vadd.f32 %v4297_v43, %v1869_v38  ;;  %1994 = vadd.xlane.f32.xlu1 %v1993_v42  ;;  %v3272_v25 = vpop.f32.mrb[29].mxu1 }
0x1abf   :  { %v1967_v14 = vmul.f32 %v3652_v44, %v4306_v39 }
0x1ac0   :  { %3657 = vtanh.f32 %v1870_v60 }
0x1ac1   :  { %v1874_v46 = vpop.f32.mrb[30].mxu1  ;;  %v1996_v13 = vsel %vm177_vm4, %v1967_v14, 0.0 }
0x1ac2   :  { %v3654_v15 = vpop.eup %3653  ;;  %v1875_v47 = vadd.f32 %v4297_v43, %v1874_v46  ;;  %1997 = vadd.xlane.f32.xlu1 %v1996_v13  ;;  %v3275_v10 = vpop.f32.mrb[31].mxu1 }
0x1ac3   :  { %v1968_v48 = vmul.f32 %v3654_v15, %v4306_v39 }
0x1ac4   :  { %3659 = vtanh.f32 %v1875_v47 }
0x1ac5   :  { %v1879_v63 = vpop.f32.mrb[32].mxu1  ;;  %v1999_v49 = vsel %vm177_vm4, %v1968_v48, 0.0  ;;  %v1835_v48 = vadd.f32 %v4297_v43, %v4148_v52 }
0x1ac6   :  { %v3656_v27 = vpop.eup %3655  ;;  %2000 = vadd.xlane.f32.xlu0 %v1999_v49  ;;  %v3278_v37 = vpop.f32.mrb[33].mxu1  ;;  %v1880_v25 = vadd.f32 %v4297_v43, %v1879_v63 }
0x1ac7   :  { %v1969_v40 = vmul.f32 %v3656_v27, %v4306_v39 }
0x1ac9   :  { %v1884_v53 = vpop.f32.mrb[34].mxu1  ;;  %v2002_v54 = vsel %vm177_vm4, %v1969_v40, 0.0 }
0x1aca   :  { %v3658_v55 = vpop.eup %3657  ;;  %2003 = vadd.xlane.f32.xlu1 %v2002_v54  ;;  %v3281_v22 = vpop.f32.mrb[35].mxu1  ;;  %v1885_v40 = vadd.f32 %v4297_v43, %v1884_v53 }
0x1acb   :  { %v1970_v56 = vmul.f32 %v3658_v55, %v4306_v39 }
0x1acd   :  { %v1889_v23 = vpop.f32.mrb[36].mxu1  ;;  %v2005_v58 = vsel %vm177_vm4, %v1970_v56, 0.0 }
0x1ace   :  { %v3660_v59 = vpop.eup %3659  ;;  %2006 = vadd.xlane.f32.xlu0 %v2005_v58  ;;  %v3284_v0 = vpop.f32.mrb[37].mxu1  ;;  %v1890_v22 = vadd.f32 %v4297_v43, %v1889_v23 }
0x1acf   :  { %v1971_v1 = vmul.f32 %v3660_v59, %v4306_v39 }
0x1ad1   :  { %v1894_v21 = vpop.f32.mrb[38].mxu1  ;;  %v2008_v29 = vsel %vm177_vm4, %v1971_v1, 0.0 }
0x1ad2   :  { %v1895_v30 = vadd.f32 %v4297_v43, %v1894_v21  ;;  %2009 = vadd.xlane.f32.xlu1 %v2008_v29  ;;  %v3287_v2 = vpop.f32.mrb[39].mxu1 }
0x1ad4   :  { %3661 = vtanh.f32 %v1895_v30 }
0x1ad5   :  { %v1899_v41 = vpop.f32.mrb[40].mxu1 }
0x1ad6   :  { %v1900_v61 = vadd.f32 %v4297_v43, %v1899_v41  ;;  %v3290_v4 = vpop.f32.mrb[41].mxu1 }
0x1ad8   :  { %3663 = vtanh.f32 %v1900_v61 }
0x1ad9   :  { %v1904_v36 = vpop.f32.mrb[42].mxu1 }
0x1ada   :  { %v1905_v16 = vadd.f32 %v4297_v43, %v1904_v36  ;;  %v3293_v18 = vpop.f32.mrb[43].mxu1 }
0x1adc   :  { %3665 = vtanh.f32 %v1905_v16 }
0x1add   :  { %v1909_v62 = vpop.f32.mrb[44].mxu1 }
0x1ade   :  { %v3662_v5 = vpop.eup %3661  ;;  %v1910_v34 = vadd.f32 %v4297_v43, %v1909_v62  ;;  %v3296_v28 = vpop.f32.mrb[45].mxu1 }
0x1adf   :  { %v1975_v6 = vmul.f32 %v3662_v5, %v4306_v39 }
0x1ae0   :  { %3667 = vtanh.f32 %v1910_v34 }
0x1ae1   :  { %v1914_v12 = vpop.f32.mrb[46].mxu1  ;;  %v2020_v35 = vsel %vm177_vm4, %v1975_v6, 0.0 }
0x1ae2   :  { %v3664_v9 = vpop.eup %3663  ;;  %v1915_v57 = vadd.f32 %v4297_v43, %v1914_v12  ;;  %2021 = vadd.xlane.f32.xlu0 %v2020_v35  ;;  %v3299_v20 = vpop.f32.mrb[47].mxu1 }
0x1ae3   :  { %v1976_v26 = vmul.f32 %v3664_v9, %v4306_v39 }
0x1ae4   :  { %3669 = vtanh.f32 %v1915_v57 }
0x1ae5   :  { %v1919_v45 = vpop.f32.mrb[48].mxu1  ;;  %v2023_v38 = vsel %vm177_vm4, %v1976_v26, 0.0  ;;  %v4371_v26 = vld [vmem:[%s4609_s4 + $0xc8] ss:$0 sm:$0xff] }
0x1ae6   :  { %v3666_v42 = vpop.eup %3665  ;;  %v1920_v44 = vadd.f32 %v4297_v43, %v1919_v45  ;;  %2024 = vadd.xlane.f32.xlu0 %v2023_v38  ;;  %v3302_v60 = vpop.f32.mrb[49].mxu1 }
0x1ae7   :  { %v1977_v14 = vmul.f32 %v3666_v42, %v4306_v39 }
0x1ae8   :  { %3671 = vtanh.f32 %v1920_v44 }
0x1ae9   :  { %v1924_v46 = vpop.f32.mrb[50].mxu1  ;;  %v2026_v13 = vsel %vm177_vm4, %v1977_v14, 0.0  ;;  %3673 = vtanh.f32 %v1880_v25 }
0x1aea   :  { %v3668_v15 = vpop.eup %3667  ;;  %v1925_v47 = vadd.f32 %v4297_v43, %v1924_v46  ;;  %2027 = vadd.xlane.f32.xlu0 %v2026_v13  ;;  %v3305_v10 = vpop.f32.mrb[51].mxu1 }
0x1aeb   :  { %v1978_v49 = vmul.f32 %v3668_v15, %v4306_v39 }
0x1aec   :  { %3675 = vtanh.f32 %v1925_v47 }
0x1aed   :  { %v1929_v27 = vpop.f32.mrb[52].mxu1  ;;  %v2029_v63 = vsel %vm177_vm4, %v1978_v49, 0.0  ;;  %3677 = vtanh.f32 %v1835_v48 }
0x1aee   :  { %v3670_v37 = vpop.eup %3669  ;;  %v1930_v54 = vadd.f32 %v4297_v43, %v1929_v27  ;;  %2030 = vadd.xlane.f32.xlu1 %v2029_v63  ;;  %v3308_v55 = vpop.f32.mrb[53].mxu1 }
0x1aef   :  { %v1979_v56 = vmul.f32 %v3670_v37, %v4306_v39 }
0x1af0   :  { %3679 = vtanh.f32 %v1930_v54 }
0x1af1   :  { %v1934_v52 = vpop.f32.mrb[54].mxu1  ;;  %v2032_v58 = vsel %vm177_vm4, %v1979_v56, 0.0  ;;  %3681 = vtanh.f32 %v1885_v40 }
0x1af2   :  { %v3672_v59 = vpop.eup %3671  ;;  %v1935_v0 = vadd.f32 %v4297_v43, %v1934_v52  ;;  %2033 = vadd.xlane.f32.xlu0 %v2032_v58  ;;  %v3311_v1 = vpop.f32.mrb[55].mxu1  ;;  %3683 = vtanh.f32 %v1890_v22 }
0x1af3   :  { %v1980_v53 = vmul.f32 %v3672_v59, %v4306_v39  ;;  %v3674_v21 = vpop.eup %3673 }
0x1af4   :  { %3685 = vtanh.f32 %v1935_v0  ;;  %v1972_v61 = vmul.f32 %v3674_v21, %v4306_v39 }
0x1af5   :  { %v2035_v29 = vsel %vm177_vm4, %v1980_v53, 0.0 }
0x1af6   :  { %v3676_v23 = vpop.eup %3675  ;;  %2036 = vadd.xlane.f32.xlu0 %v2035_v29  ;;  %v2011_v18 = vsel %vm177_vm4, %v1972_v61, 0.0 }
0x1af7   :  { %v1981_v30 = vmul.f32 %v3676_v23, %v4306_v39  ;;  %v3678_v2 = vpop.eup %3677 }
0x1af8   :  { %v1963_v5 = vmul.f32 %v3678_v2, %v4306_v39 }
0x1af9   :  { %v2038_v41 = vsel %vm177_vm4, %v1981_v30, 0.0 }
0x1afa   :  { %v3680_v4 = vpop.eup %3679  ;;  %2039 = vadd.xlane.f32.xlu1 %v2038_v41  ;;  %v1984_v6 = vsel %vm177_vm4, %v1963_v5, 0.0 }
0x1afb   :  { %v1982_v43 = vmul.f32 %v3680_v4, %v4306_v39  ;;  %v3682_v36 = vpop.eup %3681 }
0x1afc   :  { %v3684_v16 = vpop.eup %3683  ;;  %v1973_v9 = vmul.f32 %v3682_v36, %v4306_v39 }
0x1afd   :  { %v2041_v62 = vsel %vm177_vm4, %v1982_v43, 0.0  ;;  %v1974_v35 = vmul.f32 %v3684_v16, %v4306_v39 }
0x1afe   :  { %v3686_v34 = vpop.eup %3685  ;;  %2012 = vadd.xlane.f32.xlu1 %v2011_v18  ;;  %2042 = vadd.xlane.f32.xlu0 %v2041_v62  ;;  %v2014_v20 = vsel %vm177_vm4, %v1973_v9, 0.0 }
0x1aff   :  { %v1983_v28 = vmul.f32 %v3686_v34, %v4306_v39  ;;  %v2017_v57 = vsel %vm177_vm4, %v1974_v35, 0.0 }
0x1b01   :  { %v2044_v12 = vsel %vm177_vm4, %v1983_v28, 0.0 }
0x1b02   :  { %1985 = vadd.xlane.f32.xlu1 %v1984_v6  ;;  %2045 = vadd.xlane.f32.xlu0 %v2044_v12 }
0x1b06   :  { %2018 = vadd.xlane.f32.xlu1 %v2017_v57  ;;  %2015 = vadd.xlane.f32.xlu0 %v2014_v20 }
0x1b43   :  { %v1989_v45 = vpop.xlane.xlu0 %1988 }
0x1b44   :  { %v4374_v38 = vadd.f32 %v4371_v26, %v1989_v45 }
0x1b46   :  { %v2074_v44 = vrot.slane %v4374_v38, 4 }
0x1b47   :  { %v1992_v42 = vpop.xlane.xlu1 %1991 }
0x1b48   :  { %v4377_v39 = vadd.f32 %v4371_v26, %v1992_v42 }
0x1b4a   :  { %v2075_v60 = vrot.slane %v4377_v39, 4  ;;  %v2327_v39 = vrot.slane %v1340_v33, 7 }
0x1b4b   :  { %v1995_v25 = vpop.xlane.xlu1 %1994 }
0x1b4c   :  { %v2054_v14 = vadd.f32 %v4371_v26, %v1995_v25  ;;  %v2076_v46 = vsel %vm1118_vm8, %v2074_v44, %v2075_v60 }
0x1b4d   :  { %2077 = vrot.lane.b32.xlu0 %v2076_v46, %s3714_s19 }
0x1b4e   :  { %2085 = vrot.lane.b32.xlu1 %v2054_v14, %s3715_s20 }
0x1b4f   :  { %v1998_v13 = vpop.xlane.xlu1 %1997 }
0x1b50   :  { %v4388_v15 = vadd.f32 %v4371_v26, %v1998_v13 }
0x1b52   :  { %v2092_v48 = vrot.slane %v4388_v15, 4 }
0x1b53   :  { %v2001_v47 = vpop.xlane.xlu0 %2000 }
0x1b54   :  { %v4391_v10 = vadd.f32 %v4371_v26, %v2001_v47 }
0x1b56   :  { %v2093_v49 = vrot.slane %v4391_v10, 4 }
0x1b57   :  { %v2004_v27 = vpop.xlane.xlu1 %2003 }
0x1b58   :  { %v2057_v63 = vadd.f32 %v4371_v26, %v2004_v27  ;;  %v2094_v37 = vsel %vm1118_vm8, %v2092_v48, %v2093_v49 }
0x1b59   :  { %2095 = vrot.lane.b32.xlu1 %v2094_v37, %s3716_s21 }
0x1b5a   :  { %2103 = vrot.lane.b32.xlu0 %v2057_v63, %s3717_s22 }
0x1b5b   :  { %v2007_v40 = vpop.xlane.xlu0 %2006 }
0x1b5c   :  { %v4402_v54 = vadd.f32 %v4371_v26, %v2007_v40 }
0x1b5e   :  { %v2110_v56 = vrot.slane %v4402_v54, 4 }
0x1b5f   :  { %v2010_v55 = vpop.xlane.xlu1 %2009 }
0x1b60   :  { %v4405_v22 = vadd.f32 %v4371_v26, %v2010_v55 }
0x1b62   :  { %v2111_v52 = vrot.slane %v4405_v22, 4 }
0x1b64   :  { %v2112_v58 = vsel %vm1118_vm8, %v2110_v56, %v2111_v52 }
0x1b65   :  { %2113 = vrot.lane.b32.xlu1 %v2112_v58, %s3718_s23 }
0x1b6f   :  { %v2022_v59 = vpop.xlane.xlu0 %2021 }
0x1b70   :  { %v2063_v0 = vadd.f32 %v4371_v26, %v2022_v59 }
0x1b72   :  { %v2233_v1 = vrot.slane %v2063_v0, 4 }
0x1b73   :  { %v2025_v53 = vpop.xlane.xlu0 %2024 }
0x1b74   :  { %2236 = vrot.lane.b32.xlu1 %v2233_v1, %s3714_s19  ;;  %v2064_v34 = vadd.f32 %v4371_v26, %v2025_v53 }
0x1b76   :  { %v2234_v6 = vrot.slane %v2064_v34, 4 }
0x1b77   :  { %v2028_v21 = vpop.xlane.xlu0 %2027 }
0x1b78   :  { %v2065_v29 = vadd.f32 %v4371_v26, %v2028_v21  ;;  %v2235_v35 = vsel %vm1118_vm8, %v2233_v1, %v2234_v6 }
0x1b7a   :  { %2245 = vrot.lane.b32.xlu1 %v2065_v29, %s3715_s20 }
0x1b7b   :  { %v2031_v23 = vpop.xlane.xlu1 %2030 }
0x1b7c   :  { %v2066_v30 = vadd.f32 %v4371_v26, %v2031_v23 }
0x1b7e   :  { %v2251_v2 = vrot.slane %v2066_v30, 4 }
0x1b7f   :  { %v2034_v41 = vpop.xlane.xlu0 %2033 }
0x1b80   :  { %2254 = vrot.lane.b32.xlu1 %v2251_v2, %s3716_s21  ;;  %v2067_v12 = vadd.f32 %v4371_v26, %v2034_v41 }
0x1b82   :  { %v2252_v9 = vrot.slane %v2067_v12, 4 }
0x1b83   :  { %v2037_v61 = vpop.xlane.xlu0 %2036 }
0x1b84   :  { %v2068_v4 = vadd.f32 %v4371_v26, %v2037_v61  ;;  %v2253_v20 = vsel %vm1118_vm8, %v2251_v2, %v2252_v9 }
0x1b86   :  { %2263 = vrot.lane.b32.xlu1 %v2068_v4, %s3717_s22 }
0x1b87   :  { %v2040_v43 = vpop.xlane.xlu1 %2039 }
0x1b88   :  { %v2069_v36 = vadd.f32 %v4371_v26, %v2040_v43 }
0x1b8a   :  { %v2269_v16 = vrot.slane %v2069_v36, 4 }
0x1b8b   :  { %v2013_v18 = vpop.xlane.xlu1 %2012  ;;  %v2043_v62 = vpop.xlane.xlu0 %2042 }
0x1b8c   :  { %v2060_v5 = vadd.f32 %v4371_v26, %v2013_v18  ;;  %2272 = vrot.lane.b32.xlu1 %v2269_v16, %s3718_s23  ;;  %v2070_v28 = vadd.f32 %v4371_v26, %v2043_v62 }
0x1b8e   :  { %2121 = vrot.lane.b32.xlu0 %v2060_v5, %s3719_s24  ;;  %v2270_v57 = vrot.slane %v2070_v28, 4 }
0x1b8f   :  { %v2046_v45 = vpop.xlane.xlu0 %2045  ;;  %v1986_v25 = vpop.xlane.xlu1 %1985 }
0x1b90   :  { %2279 = vrot.lane.b32.xlu1 %v2070_v28, %s3719_s24  ;;  %v2271_v42 = vsel %vm1118_vm8, %v2269_v16, %v2270_v57  ;;  %v2071_v44 = vadd.f32 %v4371_v26, %v2046_v45  ;;  %v2051_v63 = vadd.f32 %v4371_v26, %v1986_v25 }
0x1b92   :  { %2243 = vrot.lane.b32.xlu0 %v2064_v34, %s3715_s20 }
0x1b93   :  { %v2019_v14 = vpop.xlane.xlu1 %2018  ;;  %v2016_v47 = vpop.xlane.xlu0 %2015 }
0x1b94   :  { %v2061_v41 = vadd.f32 %v4371_v26, %v2016_v47  ;;  %v2062_v5 = vadd.f32 %v4371_v26, %v2019_v14 }
0x1b96   :  { %2238 = vrot.lane.b32.xlu0 %v2235_v35, %s3714_s19 }
0x1b9a   :  { %2261 = vrot.lane.b32.xlu0 %v2067_v12, %s3717_s22 }
0x1b9e   :  { %2256 = vrot.lane.b32.xlu0 %v2253_v20, %s3716_s21 }
0x1ba2   :  { %2274 = vrot.lane.b32.xlu0 %v2271_v42, %s3718_s23 }
0x1ba6   :  { %2281 = vrot.lane.b32.xlu0 %v2071_v44, %s3719_s24 }
0x1bbf   :  { %v2078_v27 = vpop.permute.xlu0 %2077 }
0x1bc0   :  { %v2086_v46 = vpop.permute.xlu1 %2085  ;;  %v2128_v37 = vsel %vm2127_vm2, %v2051_v63, %v2078_v27 }
0x1bc1   :  { %v2131_v55 = vsel %vm2130_vm6, %v2128_v37, %v2086_v46 }
0x1bcb   :  { %v2096_v13 = vpop.permute.xlu1 %2095 }
0x1bcc   :  { %v2134_v56 = vsel %vm2133_vm9, %v2131_v55, %v2096_v13  ;;  %v2104_v58 = vpop.permute.xlu0 %2103 }
0x1bcd   :  { %v2136_v0 = vsel %vm1254_vm11, %v2134_v56, %v2104_v58 }
0x1bd7   :  { %v2114_v48 = vpop.permute.xlu1 %2113 }
0x1bd8   :  { %v2139_v1 = vsel %vm2138_vm13, %v2136_v0, %v2114_v48 }
0x1be6   :  { %v2237_v40 = vpop.permute.xlu1 %2236 }
0x1be7   :  { %v2285_v61 = vsel %vm2127_vm2, %v2061_v41, %v2237_v40 }
0x1bec   :  { %v2246_v59 = vpop.permute.xlu1 %2245 }
0x1bf2   :  { %v2255_v53 = vpop.permute.xlu1 %2254 }
0x1bf8   :  { %v2264_v30 = vpop.permute.xlu1 %2263 }
0x1bfe   :  { %v2273_v4 = vpop.permute.xlu1 %2272 }
0x1c00   :  { %v2122_v21 = vpop.permute.xlu0 %2121 }
0x1c01   :  { %v2142_v29 = vsel %vm2141_vm14, %v2139_v1, %v2122_v21 }
0x1c02   :  { %v2145_v23 = vsel %vm2144_vm15, %v2142_v29, -inf  ;;  %v2280_v34 = vpop.permute.xlu1 %2279 }
0x1c03   :  { %2146 = vmax.xlane.f32.xlu1 %v2145_v23 }
0x1c04   :  { %v2244_v2 = vpop.permute.xlu0 %2243 }
0x1c05   :  { %v2287_v36 = vsel %vm2130_vm6, %v2285_v61, %v2244_v2  ;;  %v60_v2 = vld [vmem:[%s4609_s4 + $0xf0] sm:$0xff]  ;;  %v62_v61 = vld [vmem:[%s4609_s4 + $0x100] sm:$0xff] }
0x1c06   :  { %v2289_v16 = vsel %vm2133_vm9, %v2287_v36, %v2255_v53 }
0x1c08   :  { %v2239_v43 = vpop.permute.xlu0 %2238 }
0x1c09   :  { %v2286_v12 = vsel %vm2127_vm2, %v2062_v5, %v2239_v43  ;;  %v63_v43 = vld [vmem:[%s4609_s4 + $0x108] sm:$0xff] }
0x1c0a   :  { %v2288_v57 = vsel %vm2130_vm6, %v2286_v12, %v2246_v59  ;;  %v3484_v36 = vpack.c.bf16 %v63_v43, %v62_v61 }
0x1c0c   :  { %v2262_v18 = vpop.permute.xlu0 %2261 }
0x1c0d   :  { %v2291_v62 = vsel %vm1254_vm11, %v2289_v16, %v2262_v18  ;;  %v56_v16 = vld [vmem:[%s4609_s4 + $0xd0] sm:$0xff]  ;;  %v57_v18 = vld [vmem:[%s4609_s4 + $0xd8] sm:$0xff] }
0x1c0e   :  { %v2293_v28 = vsel %vm2138_vm13, %v2291_v62, %v2273_v4  ;;  %v3488_v62 = vpack.c.bf16 %v57_v18, %v56_v16 }
0x1c0f   :  { %v2295_v6 = vsel %vm2141_vm14, %v2293_v28, %v2280_v34  ;;  %v58_v28 = vld [vmem:[%s4609_s4 + $0xe0] sm:$0xff] }
0x1c10   :  { %v2257_v35 = vpop.permute.xlu0 %2256  ;;  %v2298_v9 = vsel %vm2297_vm1, %v2295_v6, -inf }
0x1c11   :  { %2299 = vmax.xlane.f32.xlu0 %v2298_v9  ;;  %v2290_v20 = vsel %vm2133_vm9, %v2288_v57, %v2257_v35 }
0x1c12   :  { %v2292_v42 = vsel %vm1254_vm11, %v2290_v20, %v2264_v30 }
0x1c14   :  { %v2275_v45 = vpop.permute.xlu0 %2274 }
0x1c15   :  { %v2294_v26 = vsel %vm2138_vm13, %v2292_v42, %v2275_v45  ;;  %v67_v42 = vld [vmem:[%s4609_s4 + $0x128] sm:$0xff] }
0x1c18   :  { %v2282_v44 = vpop.permute.xlu0 %2281 }
0x1c19   :  { %v4462_v25 = vsel %vm2141_vm14, %v2294_v26, %v2282_v44  ;;  %v68_v26 = vld [vmem:[%s4609_s4 + $0x130] sm:$0xff] }
0x1c1a   :  { %v2302_v14 = vsel %vm2301_vm10, %v4462_v25, -inf }
0x1c1b   :  { %2303 = vmax.xlane.f32.xlu0 %v2302_v14  ;;  %v3524_v14 = vpack.c.bf16 %v68_v26, %v67_v42 }
0x1c90   :  { %v2147_v46 = vpop.xlane.xlu1 %2146 }
0x1c91   :  { %v2148_v13 = vsub.f32 %v2142_v29, %v2147_v46  ;;  %v2674_v46 = vrot.slane %v4101_v3, 1 }
0x1c93   :  { %v2149_v47 = vmul.f32 1.442695, %v2148_v13  ;;  %v2676_v13 = vsel %vm1116_vm7, %v4101_v3, %v2674_v46  ;;  %v73_v3 = vld [vmem:[%s4609_s4 + $0x158] sm:$0xff] }
0x1c95   :  { %3687 = vpow2.f32 %v2149_v47  ;;  %v70_v47 = vld [vmem:[%s4609_s4 + $0x140] sm:$0xff] }
0x1c9e   :  { %v2300_v48 = vpop.xlane.xlu0 %2299 }
0x1c9f   :  { %v3688_v27 = vpop.eup %3687  ;;  %v2305_v63 = vsub.f32 %v2295_v6, %v2300_v48  ;;  %v59_v6 = vld [vmem:[%s4609_s4 + $0xe8] sm:$0xff] }
0x1ca0   :  { %v2151_v37 = vsel %vm2144_vm15, %v3688_v27, 0.0  ;;  %v3492_v12 = vpack.c.bf16 %v59_v6, %v58_v28  ;;  %v71_v48 = vld [vmem:[%s4609_s4 + $0x148] sm:$0xff] }
0x1ca1   :  { %v2307_v40 = vmul.f32 1.442695, %v2305_v63  ;;  %2152 = vadd.xlane.f32.xlu1 %v2151_v37  ;;  %v3527_v63 = vpack.c.bf16 %v71_v48, %v70_v47 }
0x1ca3   :  { %3689 = vpow2.f32 %v2307_v40 }
0x1ca8   :  { %v2304_v55 = vpop.xlane.xlu0 %2303 }
0x1ca9   :  { %v2306_v56 = vsub.f32 %v4462_v25, %v2304_v55  ;;  %v2943_v55 = vld [vmem:[%s4609_s4 + $0x138] ss:$0 sm:$0xff] }
0x1cab   :  { %v2309_v58 = vmul.f32 1.442695, %v2306_v56 }
0x1cad   :  { %v3690_v59 = vpop.eup %3689  ;;  %3691 = vpow2.f32 %v2309_v58 }
0x1cae   :  { %v2311_v0 = vsel %vm2297_vm1, %v3690_v59, 0.0 }
0x1caf   :  { %2312 = vadd.xlane.f32.xlu0 %v2311_v0  ;;  %v2945_v0 = vld [vmem:[%s4609_s4 + $0x160] ss:$0 sm:$0xff] }
0x1cb7   :  { %v3692_v1 = vpop.eup %3691 }
0x1cb8   :  { %v2314_v53 = vsel %vm2301_vm10, %v3692_v1, 0.0  ;;  %vm4615_vm10 = vcmask 1045504  }
0x1cb9   :  { %2315 = vadd.xlane.f32.xlu1 %v2314_v53 }
0x1cc5   :  { %2079 = vrot.lane.b32.xlu0 %v2075_v60, %s3714_s19  ;;  %v2326_v60 = vrot.slane %v4023_v32, 7 }
0x1cc9   :  { %2105 = vrot.lane.b32.xlu0 %v4402_v54, %s3717_s22 }
0x1cca   :  { %2087 = vrot.lane.b32.xlu1 %v4388_v15, %s3715_s20  ;;  %v2328_v15 = vsel %vm1112_vm5, %v2326_v60, %v2327_v39 }
0x1ccd   :  { %2123 = vrot.lane.b32.xlu0 %v2061_v41, %s3719_s24  ;;  %v61_v41 = vld [vmem:[%s4609_s4 + $0xf8] sm:$0xff] }
0x1cce   :  { %2097 = vrot.lane.b32.xlu1 %v2093_v49, %s3716_s21  ;;  %v3480_v4 = vpack.c.bf16 %v61_v41, %v60_v2  ;;  %v2833_v2 = vrot.slane %v4462_v25, 1 }
0x1cd2   :  { %2115 = vrot.lane.b32.xlu1 %v2111_v52, %s3718_s23 }
0x1d2e   :  { %v2153_v21 = vpop.xlane.xlu1 %2152 }
0x1d2f   :  { %3693 = vrcp.f32 %v2153_v21 }
0x1d39   :  { %v3694_v54 = vpop.eup %3693 }
0x1d3a   :  { %v2155_v29 = vmul.f32 %v3694_v54, %v3688_v27  ;;  %v72_v27 = vld [vmem:[%s4609_s4 + $0x150] sm:$0xff] }
0x1d3b   :  { %v3530_v37 = vpack.c.bf16 %v73_v3, %v72_v27 }
0x1d3c   :  { %3315 = vmatmul.mubr.msk.f32.vlgmr.msra.gmra.mrb[18].mxu0 %vm2144_vm15, %v2155_v29  ;;  %v2313_v10 = vpop.xlane.xlu0 %2312 }
0x1d3d   :  { %3318 = vmatpush3.msk.msra.mxu0 %vm1124_vm12, %v2328_v15  ;;  %3319 = vmatprep.mubr.msk.f32.mxu0 %vm3708_vm3, %v3706_v24  ;;  %3695 = vrcp.f32 %v2313_v10 }
0x1d3e   :  { %3481 = vmatprep.subr.bf16.mxu0 %v3480_v4 }
0x1d40   :  { %v2080_v60 = vpop.permute.xlu0 %2079 }
0x1d41   :  { %v2129_v29 = vsel %vm2127_vm2, %v4374_v38, %v2080_v60 }
0x1d44   :  { %v2106_v10 = vpop.permute.xlu0 %2105 }
0x1d46   :  { %v2316_v49 = vpop.xlane.xlu1 %2315 }
0x1d47   :  { %3697 = vrcp.f32 %v2316_v49  ;;  %v3696_v22 = vpop.eup %3695 }
0x1d48   :  { %v2318_v17 = vmul.f32 %v3696_v22, %v3690_v59 }
0x1d4a   :  { %v2323_v32 = vrot.slane %v2318_v17, 4  ;;  %v2088_v39 = vpop.permute.xlu1 %2087 }
0x1d4b   :  { %v2132_v15 = vsel %vm2130_vm6, %v2129_v29, %v2088_v39 }
0x1d4e   :  { %v2098_v54 = vpop.permute.xlu1 %2097 }
0x1d4f   :  { %v2135_v49 = vsel %vm2133_vm9, %v2132_v15, %v2098_v54 }
0x1d50   :  { %v2137_v17 = vsel %vm1254_vm11, %v2135_v49, %v2106_v10 }
0x1d51   :  { %v3698_v33 = vpop.eup %3697 }
0x1d52   :  { %v2320_v52 = vmul.f32 %v3698_v33, %v3692_v1  ;;  %v2116_v22 = vpop.permute.xlu1 %2115 }
0x1d53   :  { %v2140_v33 = vsel %vm2138_vm13, %v2137_v17, %v2116_v22 }
0x1d54   :  { %v2324_v23 = vrot.slane %v2320_v52, 4  ;;  %v2124_v52 = vpop.permute.xlu0 %2123 }
0x1d56   :  { %v2325_v30 = vsel %vm1118_vm8, %v2323_v32, %v2324_v23  ;;  %vm3497_vm8 = vmpackc.low %vm177_vm4, %vm177_vm4  ;;  %v2143_v32 = vsel %vm2141_vm14, %v2140_v33, %v2124_v52 }
0x1d57   :  { %3320 = vmatmul.mubr.msk.f32.vlgmr.msra.gmra.mrb[20].mxu0 %vm2144_vm15, %v2325_v30  ;;  %v2837_v23 = vrot.slane %v2143_v32, 3  ;;  %v2839_v30 = vrot.slane %v4462_v25, 6  ;;  %v2835_v41 = vsel %vm1116_vm7, %v2143_v32, %v2833_v2 }
0x1d58   :  { %3483 = vmatpush3.bf16.msra.mxu0 %v3480_v4  ;;  %v2846_v4 = vsel %vm2144_vm15, %v2835_v41, 0.0 }
0x1d59   :  { %3485 = vmatprep.subr.bf16.mxu0 %v3484_v36  ;;  %v2841_v38 = vsel %vm1112_vm5, %v2837_v23, %v2839_v30 }
0x1d5a   :  { %v2851_v61 = vsel %vm2144_vm15, %v2841_v38, 0.0 }
0x1d5c   :  { %3487 = vmatpush3.bf16.msra.mxu0 %v3484_v36  ;;  %v2853_v36 = vrot.slane %v2851_v61, 2 }
0x1d5d   :  { %3489 = vmatprep.subr.bf16.mxu0 %v3488_v62 }
0x1e0f   :  { %v2227_v5 = vpop.f32.mrb[18].mxu0 }
0x1e10   :  { %v3316_v34 = vpop.f32.mrb[19].mxu0  ;;  %3330 = vmatprep.mubr.msk.f32.mxu0 %vm177_vm4, %v2227_v5 }
0x1e2a   :  { %v2399_v35 = vpop.f32.mrb[20].mxu0 }
0x1e2b   :  { %v3321_v9 = vpop.f32.mrb[21].mxu0  ;;  %3331 = vmatmul.mubr.msk.f32.vlgmr.msra.gmra.mrb[22].mxu0 %vm177_vm4, %v2399_v35 }
0x1e2c   :  { %3491 = vmatpush3.bf16.msra.mxu0 %v3488_v62  ;;  %3341 = vmatprep.mubr.msk.f32.mxu0 %vm177_vm4, %v4051_v51 }
0x1e2d   :  { %3493 = vmatprep.subr.bf16.mxu0 %v3492_v12 }
0x1e30   :  { %3495 = vmatpush3.bf16.msra.mxu0 %v3492_v12 }
0x1e31   :  { %3498 = vmatprep.subr.msk.bf16.mxu0 %vm3497_vm8, %v3769_v7 }
0x1e33   :  { %3342 = vmatmul.mubr.msk.f32.vlgmr.msra.gmra.mrb[22].mxu0 %vm177_vm4, %v4049_v50  ;;  %v2932_v50 = vld [vmem:[%s4609_s4 + $0x110] ss:$0 sm:$0xff] }
0x1e39   :  { %3501 = vmatpush3.bf16.xpose.msk.msra.mxu0 %vm3497_vm8, %v3769_v7 }
0x1e3a   :  { %3504 = vmatprep.subr.msk.bf16.mxu0 %vm3497_vm8, %v3771_v8 }
0x1e41   :  { %3507 = vmatpush3.bf16.xpose.msk.msra.mxu0 %vm3497_vm8, %v3771_v8  ;;  %v65_v8 = vld [vmem:[%s4609_s4 + $0x118] sm:$0xff] }
0x1e42   :  { %3510 = vmatprep.subr.msk.bf16.mxu0 %vm3497_vm8, %v3782_v11 }
0x1e49   :  { %3513 = vmatpush3.bf16.xpose.msk.msra.mxu0 %vm3497_vm8, %v3782_v11  ;;  %v66_v11 = vld [vmem:[%s4609_s4 + $0x120] sm:$0xff] }
0x1e4a   :  { %3516 = vmatprep.subr.msk.bf16.mxu0 %vm3497_vm8, %v3804_v19 }
0x1e51   :  { %3519 = vmatpush3.bf16.xpose.msk.msra.mxu0 %vm3497_vm8, %v3804_v19  ;;  %v3521_v19 = vpack.c.bf16 %v66_v11, %v65_v8 }
0x1e52   :  { %3520 = vmatprep.subr.bf16.mxu0 %v3707_v31 }
0x1f06   :  { %v3343_v51 = vpop.f32.mrb[22].mxu0 }
0x1f07   :  { %v2566_v7 = vadd.f32 %v3343_v51, %v2932_v50  ;;  %v2552_v57 = vpop.f32.mrb[23].mxu0 }
0x1f08   :  { %v2565_v20 = vadd.f32 %v2932_v50, %v2552_v57 }
0x1f0a   :  { %3699 = vtanh.f32 %v2565_v20 }
0x1f0b   :  { %3701 = vtanh.f32 %v2566_v7 }
0x1f14   :  { %v3700_v45 = vpop.eup %3699 }
0x1f15   :  { %v3702_v44 = vpop.eup %3701  ;;  %3360 = vmatprep.mubr.msk.f32.mxu0 %vm177_vm4, %v3700_v45 }
0x1f16   :  { %3361 = vmatmul.mubr.msk.f32.vlgmr.msra.gmra.mrb[24].mxu0 %vm177_vm4, %v3702_v44 }
0x1f17   :  { %3522 = vmatpush3.bf16.msra.mxu0 %v3521_v19  ;;  %3371 = vmatprep.mubr.msk.f32.mxu0 %vm3708_vm3, %v3706_v24 }
0x1f18   :  { %3523 = vmatprep.subr.bf16.mxu0 %v3707_v31 }
0x1f1b   :  { %3525 = vmatpush3.bf16.msra.mxu0 %v3524_v14 }
0x1f1c   :  { %3526 = vmatprep.subr.bf16.mxu0 %v3707_v31 }
0x1f1e   :  { %3372 = vmatmul.mubr.msk.f32.vlgmr.msra.gmra.mrb[26].mxu0 %vm177_vm4, %v2676_v13 }
0x1f1f   :  { %3382 = vmatprep.mubr.msk.f32.mxu0 %vm3708_vm3, %v3706_v24  ;;  %3528 = vmatpush3.bf16.msra.mxu0 %v3527_v63  ;;  %vm2847_vm3 = vcmask 64512  }
0x1f20   :  { %3529 = vmatprep.subr.bf16.mxu0 %v3707_v31 }
0x1f23   :  { %3531 = vmatpush3.bf16.msra.mxu0 %v3530_v37 }
0x1fe9   :  { %v3362_v24 = vpop.f32.mrb[24].mxu0 }
0x1fea   :  { %2857 = vst.msk [vmem:[%s4613_s5 + $0x8] sm:$0xff] %vm91_vm0, %v3362_v24  ;;  %v2665_v40 = vpop.f32.mrb[25].mxu0 }
0x1feb   :  { %2856 = vst.msk [vmem:[%s4613_s5] sm:$0xff] %vm91_vm0, %v2665_v40 }
0x1ff1   :  { %v2750_v56 = vpop.f32.mrb[26].mxu0 }
0x1ff2   :  { %v2751_v58 = vadd.f32 %v2943_v55, %v2750_v56  ;;  %v3373_v31 = vpop.f32.mrb[27].mxu0 }
0x1ff4   :  { %3703 = vtanh.f32 %v2751_v58 }
0x1ffe   :  { %v3704_v59 = vpop.eup %3703 }
0x1fff   :  { %3383 = vmatmul.mubr.msk.f32.vlgmr.msra.gmra.mrb[28].mxu0 %vm177_vm4, %v3704_v59  ;;  %vm2849_vm4 = vcmask 326656  }
0x20d2   :  { %v2828_v1 = vpop.f32.mrb[28].mxu0 }
0x20d3   :  { %v2829_v53 = vadd.f32 %v2945_v0, %v2828_v1  ;;  %v3384_v21 = vpop.f32.mrb[29].mxu0 }
0x20d5   :  { %2843 = vrot.lane.b32.xlu1 %v2829_v53, %s3720_s12 }
0x2147   :  { %v2844_v43 = vpop.permute.xlu1 %2843 }
0x2148   :  { %v2848_v16 = vsel %vm2847_vm3, %v2846_v4, %v2844_v43 }
0x2149   :  { %v2850_v18 = vsel %vm2849_vm4, %v2848_v16, 0.0 }
0x214a   :  { %v2855_v62 = vsel %vm4615_vm10, %v2850_v18, %v2853_v36 }
0x214b   :  { %2858 = vst.msk [vmem:[%s4613_s5 + $0x10] sm:$0xff] %vm91_vm0, %v2855_v62 }

</bundles_post_ra>
